<compile_context>
chip_gen: v7x
topology: tpu7x:2x2x1
jax: 0.10.0
libtpu: 0.0.40
codegen_flags: <defaults>
</compile_context>

<pallas_src>
import math

import jax
import jax.numpy as jnp
from jax.experimental import pallas as pl
from jax.experimental.pallas import tpu as pltpu


_VMEM_LIMIT_BYTES = 32 * 1024 * 1024    # scoped VMEM we request from Mosaic
_BLOCK_BUDGET_BYTES = 24 * 1024 * 1024  # double-buffered block budget (v7x-safe)


def _group_fc_kernel(h_ref, w_ref, b_ref, o_ref):
    """One grid step: process G groups.

    h_ref: (B, G, D)   activations for this group tile
    w_ref: (G, D, F)   per-group weights
    b_ref: (1, G*F)    f32 bias slice (padded to E*F in the wrapper)
    o_ref: (B, G*F)    lane-dense output slab for this tile
    """
    G, _, F = w_ref.shape
    # Static unroll: G is small and bounded by the VMEM budget.  Back-to-back
    # MXU matmuls pipeline well; per-chunk ref loads keep vreg pressure low.
    for g in range(G):
        acc = jnp.dot(h_ref[:, g, :], w_ref[g],
                      preferred_element_type=jnp.float32)       # (B, F) f32
        acc = acc + b_ref[:, g * F:(g + 1) * F]                  # fused bias (f32)
        o_ref[:, g * F:(g + 1) * F] = acc.astype(o_ref.dtype)


def _valid_group_tile(E, F, G):
    # Block legality:
    #   h block (B, G, D)  -> G (second-to-last dim) must be %8 or == E
    #   out/bias block (*, G*F) -> G*F must be %128 or == E*F
    if E % G != 0:
        return False
    ok_sublane = (G % 8 == 0) or (G == E)
    ok_lane = ((G * F) % 128 == 0) or (G == E)
    return ok_sublane and ok_lane


def _block_bytes(B, D, F, G, in_itemsize, out_itemsize):
    h_b = B * G * D * in_itemsize
    w_b = G * D * F * in_itemsize
    b_b = G * F * 4
    o_b = B * G * F * out_itemsize
    return 2 * (h_b + w_b + b_b + o_b)   # x2: BlockSpec double-buffering


def _choose_group_tile(B, E, D, F, in_itemsize, out_itemsize,
                       budget_bytes=_BLOCK_BUDGET_BYTES):
    candidates = [
        G for G in range(1, E + 1)
        if _valid_group_tile(E, F, G)
        and _block_bytes(B, D, F, G, in_itemsize, out_itemsize) <= budget_bytes
    ]
    if not candidates:
        # Single step over all groups (block dims == full dims, always legal).
        # TODO(synk): pad E up to a multiple of 8 when E has no suitable
        # divisor and a single step would exceed the VMEM budget.
        return E
    # Prefer an even number of grid steps (clean 2-TensorCore split on v7x),
    # then the largest tile (fewer steps -> less per-step overhead).
    return max(candidates, key=lambda G: (((E // G) % 2) == 0, G))


def group_fc_forward(h, duplicate_pooling, duplicate_pooling_bias, num_classes,
                     *, compute_dtype=None, group_tile=None):
    """GroupFC.forward (zsl=False path).

    h:                      [B, E, D]
    duplicate_pooling:      [E, D, F]   (stacked per-group weights)
    duplicate_pooling_bias: [num_classes]
    returns:                [B, num_classes]
    """
    B, E, D = h.shape
    E_w, D_w, F = duplicate_pooling.shape
    if (E_w, D_w) != (E, D):
        raise ValueError("weight shape mismatch with h")
    if num_classes > E * F:
        raise ValueError(f"num_classes={num_classes} > E*F={E * F}")

    out_dtype = h.dtype
    if compute_dtype is not None:
        h = h.astype(compute_dtype)
        duplicate_pooling = duplicate_pooling.astype(compute_dtype)

    if group_tile is None:
        G = _choose_group_tile(B, E, D, F, h.dtype.itemsize,
                               jnp.dtype(out_dtype).itemsize)
    else:
        G = int(group_tile)
    if not _valid_group_tile(E, F, G):
        raise ValueError(f"invalid group tile G={G} for E={E}, F={F}")

    # Bias padded once to the full lane-dense width, kept in f32 so the add
    # happens on the f32 accumulator inside the kernel.
    bias_full = jnp.zeros((1, E * F), jnp.float32)
    bias_full = bias_full.at[0, :num_classes].set(
        duplicate_pooling_bias.astype(jnp.float32))

    out = pl.pallas_call(
        _group_fc_kernel,
        out_shape=jax.ShapeDtypeStruct((B, E * F), out_dtype),
        grid=(E // G,),
        in_specs=[
            # NOTE: B and D must stay full-extent in these blocks (the (8,128)
            # constraint is satisfied because the trailing dims equal the full
            # array dims); revisit if batch tiling is ever added.
            pl.BlockSpec((B, G, D), lambda i: (0, i, 0)),
            pl.BlockSpec((G, D, F), lambda i: (i, 0, 0)),
            pl.BlockSpec((1, G * F), lambda i: (0, i)),
        ],
        out_specs=pl.BlockSpec((B, G * F), lambda i: (0, i)),
        compiler_params=pltpu.CompilerParams(
            dimension_semantics=("parallel",),
            vmem_limit_bytes=_VMEM_LIMIT_BYTES,
        ),
    )(h, duplicate_pooling, bias_full)

    return out[:, :num_classes]


def init_params(key, embed_len_decoder, decoder_embedding, duplicate_factor,
                num_classes, dtype=jnp.float32):
    # Xavier-normal init for each (D, F) weight, bias = 0 (as in the module).
    std = math.sqrt(2.0 / float(decoder_embedding + duplicate_factor))
    w = std * jax.random.normal(
        key, (embed_len_decoder, decoder_embedding, duplicate_factor), dtype)
    b = jnp.zeros((num_classes,), dtype)
    return w, b


if __name__ == "__main__":
    # Small, module-consistent shapes.
    B = 4               # batch
    E = 32              # embed_len_decoder (number of query groups)
    D = 64              # decoder_embedding
    F = 16              # duplicate_factor
    num_classes = 500   # <= E * F = 512

    key = jax.random.PRNGKey(0)
    k_h, k_w = jax.random.split(key)

    h = jax.random.normal(k_h, (B, E, D), jnp.float32)
    w, _ = init_params(k_w, E, D, F, num_classes)
    # Non-zero bias so the fused bias-add is actually exercised.
    bias = 0.1 * jnp.arange(num_classes, dtype=jnp.float32)

    # --- f32 path (default, matches the PyTorch module's dtype behavior) ---
    out = jax.block_until_ready(group_fc_forward(h, w, bias, num_classes))
    ref = (jnp.einsum("bed,edf->bef", h, w)
           .reshape(B, E * F)[:, :num_classes] + bias)
    assert out.shape == (B, num_classes)
    assert jnp.allclose(out, ref, atol=1e-4, rtol=1e-4), (
        "f32 mismatch, max abs err = %f" % float(jnp.max(jnp.abs(out - ref))))

    # --- explicit group_tile path (single-step grid, full-extent blocks) ---
    out_single = jax.block_until_ready(
        group_fc_forward(h, w, bias, num_classes, group_tile=E))
    assert jnp.allclose(out_single, ref, atol=1e-4, rtol=1e-4), (
        "single-tile mismatch, max abs err = %f"
        % float(jnp.max(jnp.abs(out_single - ref))))

    # NOTE: compute_dtype=jnp.bfloat16 (bf16 MXU inputs, f32 accumulation) is
    # supported by group_fc_forward for real-TPU use but is intentionally not
    # exercised here: the sandbox may run this script under the CPU interpret
    # path, whose dot thunk rejects BF16 x BF16 -> F32 (previous failure).

    print("KERNEL_OK")
</pallas_src>

<mosaic_0001>
module attributes {stable_mosaic.version = 11 : i64} {
  func.func @_group_fc_kernel(%arg0: i32, %arg1: memref<4x16x64xf32, #tpu.memory_space<vmem>>, %arg2: memref<16x64x16xf32, #tpu.memory_space<vmem>>, %arg3: memref<1x256xf32, #tpu.memory_space<vmem>>, %arg4: memref<4x256xf32, #tpu.memory_space<vmem>>) attributes {dimension_semantics = [#tpu.dimension_semantics<parallel>], iteration_bounds = array<i64: 2>, scalar_prefetch = 0 : i64, scratch_operands = 0 : i64, tpu.core_type = #tpu.core_type<tc>, window_params = [{transform_indices = @transform_0, window_bounds = array<i64: 4, 16, 64>}, {transform_indices = @transform_1, window_bounds = array<i64: 16, 64, 16>}, {transform_indices = @transform_2, window_bounds = array<i64: 1, 256>}, {transform_indices = @transform_3, window_bounds = array<i64: 4, 256>}]} {
    %c0 = arith.constant 0 : index
    %c0_0 = arith.constant 0 : index
    %c0_1 = arith.constant 0 : index
    %0 = vector.load %arg1[%c0, %c0_0, %c0_1] : memref<4x16x64xf32, #tpu.memory_space<vmem>>, vector<4x1x64xf32>
    %1 = vector.shape_cast %0 : vector<4x1x64xf32> to vector<4x64xf32>
    %c0_2 = arith.constant 0 : index
    %c0_3 = arith.constant 0 : index
    %c0_4 = arith.constant 0 : index
    %2 = vector.load %arg2[%c0_2, %c0_3, %c0_4] : memref<16x64x16xf32, #tpu.memory_space<vmem>>, vector<1x64x16xf32>
    %3 = vector.shape_cast %2 : vector<1x64x16xf32> to vector<64x16xf32>
    %cst = arith.constant dense<0.000000e+00> : vector<4x16xf32>
    %4 = tpu.matmul %1, %3, %cst {dimension_numbers = #tpu.dot_dimension_numbers<[1], [0], [0], [1], [0, 0, 1, 1], [], []>} : vector<4x64xf32>, vector<64x16xf32>, vector<4x16xf32> -> vector<4x16xf32>
    %c0_5 = arith.constant 0 : index
    %c0_6 = arith.constant 0 : index
    %5 = vector.load %arg3[%c0_5, %c0_6] : memref<1x256xf32, #tpu.memory_space<vmem>>, vector<1x16xf32>
    %6 = vector.broadcast %5 : vector<1x16xf32> to vector<4x16xf32>
    %7 = arith.addf %4, %6 : vector<4x16xf32>
    %c0_7 = arith.constant 0 : index
    %c0_8 = arith.constant 0 : index
    %8 = vector.load %arg4[%c0_7, %c0_8] : memref<4x256xf32, #tpu.memory_space<vmem>>, vector<4x16xf32>
    tpu.vector_store %arg4[%c0_7, %c0_8], %7 {strides = array<i32>} : memref<4x256xf32, #tpu.memory_space<vmem>>, vector<4x16xf32>,
    %c0_9 = arith.constant 0 : index
    %c1 = arith.constant 1 : index
    %c0_10 = arith.constant 0 : index
    %9 = vector.load %arg1[%c0_9, %c1, %c0_10] : memref<4x16x64xf32, #tpu.memory_space<vmem>>, vector<4x1x64xf32>
    %10 = vector.shape_cast %9 : vector<4x1x64xf32> to vector<4x64xf32>
    %c1_11 = arith.constant 1 : index
    %c0_12 = arith.constant 0 : index
    %c0_13 = arith.constant 0 : index
    %11 = vector.load %arg2[%c1_11, %c0_12, %c0_13] : memref<16x64x16xf32, #tpu.memory_space<vmem>>, vector<1x64x16xf32>
    %12 = vector.shape_cast %11 : vector<1x64x16xf32> to vector<64x16xf32>
    %cst_14 = arith.constant dense<0.000000e+00> : vector<4x16xf32>
    %13 = tpu.matmul %10, %12, %cst_14 {dimension_numbers = #tpu.dot_dimension_numbers<[1], [0], [0], [1], [0, 0, 1, 1], [], []>} : vector<4x64xf32>, vector<64x16xf32>, vector<4x16xf32> -> vector<4x16xf32>
    %c0_15 = arith.constant 0 : index
    %c16 = arith.constant 16 : index
    %14 = vector.load %arg3[%c0_15, %c16] : memref<1x256xf32, #tpu.memory_space<vmem>>, vector<1x16xf32>
    %15 = vector.broadcast %14 : vector<1x16xf32> to vector<4x16xf32>
    %16 = arith.addf %13, %15 : vector<4x16xf32>
    %c0_16 = arith.constant 0 : index
    %c16_17 = arith.constant 16 : index
    %17 = vector.load %arg4[%c0_16, %c16_17] : memref<4x256xf32, #tpu.memory_space<vmem>>, vector<4x16xf32>
    tpu.vector_store %arg4[%c0_16, %c16_17], %16 {strides = array<i32>} : memref<4x256xf32, #tpu.memory_space<vmem>>, vector<4x16xf32>,
    %c0_18 = arith.constant 0 : index
    %c2 = arith.constant 2 : index
    %c0_19 = arith.constant 0 : index
    %18 = vector.load %arg1[%c0_18, %c2, %c0_19] : memref<4x16x64xf32, #tpu.memory_space<vmem>>, vector<4x1x64xf32>
    %19 = vector.shape_cast %18 : vector<4x1x64xf32> to vector<4x64xf32>
    %c2_20 = arith.constant 2 : index
    %c0_21 = arith.constant 0 : index
    %c0_22 = arith.constant 0 : index
    %20 = vector.load %arg2[%c2_20, %c0_21, %c0_22] : memref<16x64x16xf32, #tpu.memory_space<vmem>>, vector<1x64x16xf32>
    %21 = vector.shape_cast %20 : vector<1x64x16xf32> to vector<64x16xf32>
    %cst_23 = arith.constant dense<0.000000e+00> : vector<4x16xf32>
    %22 = tpu.matmul %19, %21, %cst_23 {dimension_numbers = #tpu.dot_dimension_numbers<[1], [0], [0], [1], [0, 0, 1, 1], [], []>} : vector<4x64xf32>, vector<64x16xf32>, vector<4x16xf32> -> vector<4x16xf32>
    %c0_24 = arith.constant 0 : index
    %c32 = arith.constant 32 : index
    %23 = vector.load %arg3[%c0_24, %c32] : memref<1x256xf32, #tpu.memory_space<vmem>>, vector<1x16xf32>
    %24 = vector.broadcast %23 : vector<1x16xf32> to vector<4x16xf32>
    %25 = arith.addf %22, %24 : vector<4x16xf32>
    %c0_25 = arith.constant 0 : index
    %c32_26 = arith.constant 32 : index
    %26 = vector.load %arg4[%c0_25, %c32_26] : memref<4x256xf32, #tpu.memory_space<vmem>>, vector<4x16xf32>
    tpu.vector_store %arg4[%c0_25, %c32_26], %25 {strides = array<i32>} : memref<4x256xf32, #tpu.memory_space<vmem>>, vector<4x16xf32>,
    %c0_27 = arith.constant 0 : index
    %c3 = arith.constant 3 : index
    %c0_28 = arith.constant 0 : index
    %27 = vector.load %arg1[%c0_27, %c3, %c0_28] : memref<4x16x64xf32, #tpu.memory_space<vmem>>, vector<4x1x64xf32>
    %28 = vector.shape_cast %27 : vector<4x1x64xf32> to vector<4x64xf32>
    %c3_29 = arith.constant 3 : index
    %c0_30 = arith.constant 0 : index
    %c0_31 = arith.constant 0 : index
    %29 = vector.load %arg2[%c3_29, %c0_30, %c0_31] : memref<16x64x16xf32, #tpu.memory_space<vmem>>, vector<1x64x16xf32>
    %30 = vector.shape_cast %29 : vector<1x64x16xf32> to vector<64x16xf32>
    %cst_32 = arith.constant dense<0.000000e+00> : vector<4x16xf32>
    %31 = tpu.matmul %28, %30, %cst_32 {dimension_numbers = #tpu.dot_dimension_numbers<[1], [0], [0], [1], [0, 0, 1, 1], [], []>} : vector<4x64xf32>, vector<64x16xf32>, vector<4x16xf32> -> vector<4x16xf32>
    %c0_33 = arith.constant 0 : index
    %c48 = arith.constant 48 : index
    %32 = vector.load %arg3[%c0_33, %c48] : memref<1x256xf32, #tpu.memory_space<vmem>>, vector<1x16xf32>
    %33 = vector.broadcast %32 : vector<1x16xf32> to vector<4x16xf32>
    %34 = arith.addf %31, %33 : vector<4x16xf32>
    %c0_34 = arith.constant 0 : index
    %c48_35 = arith.constant 48 : index
    %35 = vector.load %arg4[%c0_34, %c48_35] : memref<4x256xf32, #tpu.memory_space<vmem>>, vector<4x16xf32>
    tpu.vector_store %arg4[%c0_34, %c48_35], %34 {strides = array<i32>} : memref<4x256xf32, #tpu.memory_space<vmem>>, vector<4x16xf32>,
    %c0_36 = arith.constant 0 : index
    %c4 = arith.constant 4 : index
    %c0_37 = arith.constant 0 : index
    %36 = vector.load %arg1[%c0_36, %c4, %c0_37] : memref<4x16x64xf32, #tpu.memory_space<vmem>>, vector<4x1x64xf32>
    %37 = vector.shape_cast %36 : vector<4x1x64xf32> to vector<4x64xf32>
    %c4_38 = arith.constant 4 : index
    %c0_39 = arith.constant 0 : index
    %c0_40 = arith.constant 0 : index
    %38 = vector.load %arg2[%c4_38, %c0_39, %c0_40] : memref<16x64x16xf32, #tpu.memory_space<vmem>>, vector<1x64x16xf32>
    %39 = vector.shape_cast %38 : vector<1x64x16xf32> to vector<64x16xf32>
    %cst_41 = arith.constant dense<0.000000e+00> : vector<4x16xf32>
    %40 = tpu.matmul %37, %39, %cst_41 {dimension_numbers = #tpu.dot_dimension_numbers<[1], [0], [0], [1], [0, 0, 1, 1], [], []>} : vector<4x64xf32>, vector<64x16xf32>, vector<4x16xf32> -> vector<4x16xf32>
    %c0_42 = arith.constant 0 : index
    %c64 = arith.constant 64 : index
    %41 = vector.load %arg3[%c0_42, %c64] : memref<1x256xf32, #tpu.memory_space<vmem>>, vector<1x16xf32>
    %42 = vector.broadcast %41 : vector<1x16xf32> to vector<4x16xf32>
    %43 = arith.addf %40, %42 : vector<4x16xf32>
    %c0_43 = arith.constant 0 : index
    %c64_44 = arith.constant 64 : index
    %44 = vector.load %arg4[%c0_43, %c64_44] : memref<4x256xf32, #tpu.memory_space<vmem>>, vector<4x16xf32>
    tpu.vector_store %arg4[%c0_43, %c64_44], %43 {strides = array<i32>} : memref<4x256xf32, #tpu.memory_space<vmem>>, vector<4x16xf32>,
    %c0_45 = arith.constant 0 : index
    %c5 = arith.constant 5 : index
    %c0_46 = arith.constant 0 : index
    %45 = vector.load %arg1[%c0_45, %c5, %c0_46] : memref<4x16x64xf32, #tpu.memory_space<vmem>>, vector<4x1x64xf32>
    %46 = vector.shape_cast %45 : vector<4x1x64xf32> to vector<4x64xf32>
    %c5_47 = arith.constant 5 : index
    %c0_48 = arith.constant 0 : index
    %c0_49 = arith.constant 0 : index
    %47 = vector.load %arg2[%c5_47, %c0_48, %c0_49] : memref<16x64x16xf32, #tpu.memory_space<vmem>>, vector<1x64x16xf32>
    %48 = vector.shape_cast %47 : vector<1x64x16xf32> to vector<64x16xf32>
    %cst_50 = arith.constant dense<0.000000e+00> : vector<4x16xf32>
    %49 = tpu.matmul %46, %48, %cst_50 {dimension_numbers = #tpu.dot_dimension_numbers<[1], [0], [0], [1], [0, 0, 1, 1], [], []>} : vector<4x64xf32>, vector<64x16xf32>, vector<4x16xf32> -> vector<4x16xf32>
    %c0_51 = arith.constant 0 : index
    %c80 = arith.constant 80 : index
    %50 = vector.load %arg3[%c0_51, %c80] : memref<1x256xf32, #tpu.memory_space<vmem>>, vector<1x16xf32>
    %51 = vector.broadcast %50 : vector<1x16xf32> to vector<4x16xf32>
    %52 = arith.addf %49, %51 : vector<4x16xf32>
    %c0_52 = arith.constant 0 : index
    %c80_53 = arith.constant 80 : index
    %53 = vector.load %arg4[%c0_52, %c80_53] : memref<4x256xf32, #tpu.memory_space<vmem>>, vector<4x16xf32>
    tpu.vector_store %arg4[%c0_52, %c80_53], %52 {strides = array<i32>} : memref<4x256xf32, #tpu.memory_space<vmem>>, vector<4x16xf32>,
    %c0_54 = arith.constant 0 : index
    %c6 = arith.constant 6 : index
    %c0_55 = arith.constant 0 : index
    %54 = vector.load %arg1[%c0_54, %c6, %c0_55] : memref<4x16x64xf32, #tpu.memory_space<vmem>>, vector<4x1x64xf32>
    %55 = vector.shape_cast %54 : vector<4x1x64xf32> to vector<4x64xf32>
    %c6_56 = arith.constant 6 : index
    %c0_57 = arith.constant 0 : index
    %c0_58 = arith.constant 0 : index
    %56 = vector.load %arg2[%c6_56, %c0_57, %c0_58] : memref<16x64x16xf32, #tpu.memory_space<vmem>>, vector<1x64x16xf32>
    %57 = vector.shape_cast %56 : vector<1x64x16xf32> to vector<64x16xf32>
    %cst_59 = arith.constant dense<0.000000e+00> : vector<4x16xf32>
    %58 = tpu.matmul %55, %57, %cst_59 {dimension_numbers = #tpu.dot_dimension_numbers<[1], [0], [0], [1], [0, 0, 1, 1], [], []>} : vector<4x64xf32>, vector<64x16xf32>, vector<4x16xf32> -> vector<4x16xf32>
    %c0_60 = arith.constant 0 : index
    %c96 = arith.constant 96 : index
    %59 = vector.load %arg3[%c0_60, %c96] : memref<1x256xf32, #tpu.memory_space<vmem>>, vector<1x16xf32>
    %60 = vector.broadcast %59 : vector<1x16xf32> to vector<4x16xf32>
    %61 = arith.addf %58, %60 : vector<4x16xf32>
    %c0_61 = arith.constant 0 : index
    %c96_62 = arith.constant 96 : index
    %62 = vector.load %arg4[%c0_61, %c96_62] : memref<4x256xf32, #tpu.memory_space<vmem>>, vector<4x16xf32>
    tpu.vector_store %arg4[%c0_61, %c96_62], %61 {strides = array<i32>} : memref<4x256xf32, #tpu.memory_space<vmem>>, vector<4x16xf32>,
    %c0_63 = arith.constant 0 : index
    %c7 = arith.constant 7 : index
    %c0_64 = arith.constant 0 : index
    %63 = vector.load %arg1[%c0_63, %c7, %c0_64] : memref<4x16x64xf32, #tpu.memory_space<vmem>>, vector<4x1x64xf32>
    %64 = vector.shape_cast %63 : vector<4x1x64xf32> to vector<4x64xf32>
    %c7_65 = arith.constant 7 : index
    %c0_66 = arith.constant 0 : index
    %c0_67 = arith.constant 0 : index
    %65 = vector.load %arg2[%c7_65, %c0_66, %c0_67] : memref<16x64x16xf32, #tpu.memory_space<vmem>>, vector<1x64x16xf32>
    %66 = vector.shape_cast %65 : vector<1x64x16xf32> to vector<64x16xf32>
    %cst_68 = arith.constant dense<0.000000e+00> : vector<4x16xf32>
    %67 = tpu.matmul %64, %66, %cst_68 {dimension_numbers = #tpu.dot_dimension_numbers<[1], [0], [0], [1], [0, 0, 1, 1], [], []>} : vector<4x64xf32>, vector<64x16xf32>, vector<4x16xf32> -> vector<4x16xf32>
    %c0_69 = arith.constant 0 : index
    %c112 = arith.constant 112 : index
    %68 = vector.load %arg3[%c0_69, %c112] : memref<1x256xf32, #tpu.memory_space<vmem>>, vector<1x16xf32>
    %69 = vector.broadcast %68 : vector<1x16xf32> to vector<4x16xf32>
    %70 = arith.addf %67, %69 : vector<4x16xf32>
    %c0_70 = arith.constant 0 : index
    %c112_71 = arith.constant 112 : index
    %71 = vector.load %arg4[%c0_70, %c112_71] : memref<4x256xf32, #tpu.memory_space<vmem>>, vector<4x16xf32>
    tpu.vector_store %arg4[%c0_70, %c112_71], %70 {strides = array<i32>} : memref<4x256xf32, #tpu.memory_space<vmem>>, vector<4x16xf32>,
    %c0_72 = arith.constant 0 : index
    %c8 = arith.constant 8 : index
    %c0_73 = arith.constant 0 : index
    %72 = vector.load %arg1[%c0_72, %c8, %c0_73] : memref<4x16x64xf32, #tpu.memory_space<vmem>>, vector<4x1x64xf32>
    %73 = vector.shape_cast %72 : vector<4x1x64xf32> to vector<4x64xf32>
    %c8_74 = arith.constant 8 : index
    %c0_75 = arith.constant 0 : index
    %c0_76 = arith.constant 0 : index
    %74 = vector.load %arg2[%c8_74, %c0_75, %c0_76] : memref<16x64x16xf32, #tpu.memory_space<vmem>>, vector<1x64x16xf32>
    %75 = vector.shape_cast %74 : vector<1x64x16xf32> to vector<64x16xf32>
    %cst_77 = arith.constant dense<0.000000e+00> : vector<4x16xf32>
    %76 = tpu.matmul %73, %75, %cst_77 {dimension_numbers = #tpu.dot_dimension_numbers<[1], [0], [0], [1], [0, 0, 1, 1], [], []>} : vector<4x64xf32>, vector<64x16xf32>, vector<4x16xf32> -> vector<4x16xf32>
    %c0_78 = arith.constant 0 : index
    %c128 = arith.constant 128 : index
    %77 = vector.load %arg3[%c0_78, %c128] : memref<1x256xf32, #tpu.memory_space<vmem>>, vector<1x16xf32>
    %78 = vector.broadcast %77 : vector<1x16xf32> to vector<4x16xf32>
    %79 = arith.addf %76, %78 : vector<4x16xf32>
    %c0_79 = arith.constant 0 : index
    %c128_80 = arith.constant 128 : index
    %80 = vector.load %arg4[%c0_79, %c128_80] : memref<4x256xf32, #tpu.memory_space<vmem>>, vector<4x16xf32>
    tpu.vector_store %arg4[%c0_79, %c128_80], %79 {strides = array<i32>} : memref<4x256xf32, #tpu.memory_space<vmem>>, vector<4x16xf32>,
    %c0_81 = arith.constant 0 : index
    %c9 = arith.constant 9 : index
    %c0_82 = arith.constant 0 : index
    %81 = vector.load %arg1[%c0_81, %c9, %c0_82] : memref<4x16x64xf32, #tpu.memory_space<vmem>>, vector<4x1x64xf32>
    %82 = vector.shape_cast %81 : vector<4x1x64xf32> to vector<4x64xf32>
    %c9_83 = arith.constant 9 : index
    %c0_84 = arith.constant 0 : index
    %c0_85 = arith.constant 0 : index
    %83 = vector.load %arg2[%c9_83, %c0_84, %c0_85] : memref<16x64x16xf32, #tpu.memory_space<vmem>>, vector<1x64x16xf32>
    %84 = vector.shape_cast %83 : vector<1x64x16xf32> to vector<64x16xf32>
    %cst_86 = arith.constant dense<0.000000e+00> : vector<4x16xf32>
    %85 = tpu.matmul %82, %84, %cst_86 {dimension_numbers = #tpu.dot_dimension_numbers<[1], [0], [0], [1], [0, 0, 1, 1], [], []>} : vector<4x64xf32>, vector<64x16xf32>, vector<4x16xf32> -> vector<4x16xf32>
    %c0_87 = arith.constant 0 : index
    %c144 = arith.constant 144 : index
    %86 = vector.load %arg3[%c0_87, %c144] : memref<1x256xf32, #tpu.memory_space<vmem>>, vector<1x16xf32>
    %87 = vector.broadcast %86 : vector<1x16xf32> to vector<4x16xf32>
    %88 = arith.addf %85, %87 : vector<4x16xf32>
    %c0_88 = arith.constant 0 : index
    %c144_89 = arith.constant 144 : index
    %89 = vector.load %arg4[%c0_88, %c144_89] : memref<4x256xf32, #tpu.memory_space<vmem>>, vector<4x16xf32>
    tpu.vector_store %arg4[%c0_88, %c144_89], %88 {strides = array<i32>} : memref<4x256xf32, #tpu.memory_space<vmem>>, vector<4x16xf32>,
    %c0_90 = arith.constant 0 : index
    %c10 = arith.constant 10 : index
    %c0_91 = arith.constant 0 : index
    %90 = vector.load %arg1[%c0_90, %c10, %c0_91] : memref<4x16x64xf32, #tpu.memory_space<vmem>>, vector<4x1x64xf32>
    %91 = vector.shape_cast %90 : vector<4x1x64xf32> to vector<4x64xf32>
    %c10_92 = arith.constant 10 : index
    %c0_93 = arith.constant 0 : index
    %c0_94 = arith.constant 0 : index
    %92 = vector.load %arg2[%c10_92, %c0_93, %c0_94] : memref<16x64x16xf32, #tpu.memory_space<vmem>>, vector<1x64x16xf32>
    %93 = vector.shape_cast %92 : vector<1x64x16xf32> to vector<64x16xf32>
    %cst_95 = arith.constant dense<0.000000e+00> : vector<4x16xf32>
    %94 = tpu.matmul %91, %93, %cst_95 {dimension_numbers = #tpu.dot_dimension_numbers<[1], [0], [0], [1], [0, 0, 1, 1], [], []>} : vector<4x64xf32>, vector<64x16xf32>, vector<4x16xf32> -> vector<4x16xf32>
    %c0_96 = arith.constant 0 : index
    %c160 = arith.constant 160 : index
    %95 = vector.load %arg3[%c0_96, %c160] : memref<1x256xf32, #tpu.memory_space<vmem>>, vector<1x16xf32>
    %96 = vector.broadcast %95 : vector<1x16xf32> to vector<4x16xf32>
    %97 = arith.addf %94, %96 : vector<4x16xf32>
    %c0_97 = arith.constant 0 : index
    %c160_98 = arith.constant 160 : index
    %98 = vector.load %arg4[%c0_97, %c160_98] : memref<4x256xf32, #tpu.memory_space<vmem>>, vector<4x16xf32>
    tpu.vector_store %arg4[%c0_97, %c160_98], %97 {strides = array<i32>} : memref<4x256xf32, #tpu.memory_space<vmem>>, vector<4x16xf32>,
    %c0_99 = arith.constant 0 : index
    %c11 = arith.constant 11 : index
    %c0_100 = arith.constant 0 : index
    %99 = vector.load %arg1[%c0_99, %c11, %c0_100] : memref<4x16x64xf32, #tpu.memory_space<vmem>>, vector<4x1x64xf32>
    %100 = vector.shape_cast %99 : vector<4x1x64xf32> to vector<4x64xf32>
    %c11_101 = arith.constant 11 : index
    %c0_102 = arith.constant 0 : index
    %c0_103 = arith.constant 0 : index
    %101 = vector.load %arg2[%c11_101, %c0_102, %c0_103] : memref<16x64x16xf32, #tpu.memory_space<vmem>>, vector<1x64x16xf32>
    %102 = vector.shape_cast %101 : vector<1x64x16xf32> to vector<64x16xf32>
    %cst_104 = arith.constant dense<0.000000e+00> : vector<4x16xf32>
    %103 = tpu.matmul %100, %102, %cst_104 {dimension_numbers = #tpu.dot_dimension_numbers<[1], [0], [0], [1], [0, 0, 1, 1], [], []>} : vector<4x64xf32>, vector<64x16xf32>, vector<4x16xf32> -> vector<4x16xf32>
    %c0_105 = arith.constant 0 : index
    %c176 = arith.constant 176 : index
    %104 = vector.load %arg3[%c0_105, %c176] : memref<1x256xf32, #tpu.memory_space<vmem>>, vector<1x16xf32>
    %105 = vector.broadcast %104 : vector<1x16xf32> to vector<4x16xf32>
    %106 = arith.addf %103, %105 : vector<4x16xf32>
    %c0_106 = arith.constant 0 : index
    %c176_107 = arith.constant 176 : index
    %107 = vector.load %arg4[%c0_106, %c176_107] : memref<4x256xf32, #tpu.memory_space<vmem>>, vector<4x16xf32>
    tpu.vector_store %arg4[%c0_106, %c176_107], %106 {strides = array<i32>} : memref<4x256xf32, #tpu.memory_space<vmem>>, vector<4x16xf32>,
    %c0_108 = arith.constant 0 : index
    %c12 = arith.constant 12 : index
    %c0_109 = arith.constant 0 : index
    %108 = vector.load %arg1[%c0_108, %c12, %c0_109] : memref<4x16x64xf32, #tpu.memory_space<vmem>>, vector<4x1x64xf32>
    %109 = vector.shape_cast %108 : vector<4x1x64xf32> to vector<4x64xf32>
    %c12_110 = arith.constant 12 : index
    %c0_111 = arith.constant 0 : index
    %c0_112 = arith.constant 0 : index
    %110 = vector.load %arg2[%c12_110, %c0_111, %c0_112] : memref<16x64x16xf32, #tpu.memory_space<vmem>>, vector<1x64x16xf32>
    %111 = vector.shape_cast %110 : vector<1x64x16xf32> to vector<64x16xf32>
    %cst_113 = arith.constant dense<0.000000e+00> : vector<4x16xf32>
    %112 = tpu.matmul %109, %111, %cst_113 {dimension_numbers = #tpu.dot_dimension_numbers<[1], [0], [0], [1], [0, 0, 1, 1], [], []>} : vector<4x64xf32>, vector<64x16xf32>, vector<4x16xf32> -> vector<4x16xf32>
    %c0_114 = arith.constant 0 : index
    %c192 = arith.constant 192 : index
    %113 = vector.load %arg3[%c0_114, %c192] : memref<1x256xf32, #tpu.memory_space<vmem>>, vector<1x16xf32>
    %114 = vector.broadcast %113 : vector<1x16xf32> to vector<4x16xf32>
    %115 = arith.addf %112, %114 : vector<4x16xf32>
    %c0_115 = arith.constant 0 : index
    %c192_116 = arith.constant 192 : index
    %116 = vector.load %arg4[%c0_115, %c192_116] : memref<4x256xf32, #tpu.memory_space<vmem>>, vector<4x16xf32>
    tpu.vector_store %arg4[%c0_115, %c192_116], %115 {strides = array<i32>} : memref<4x256xf32, #tpu.memory_space<vmem>>, vector<4x16xf32>,
    %c0_117 = arith.constant 0 : index
    %c13 = arith.constant 13 : index
    %c0_118 = arith.constant 0 : index
    %117 = vector.load %arg1[%c0_117, %c13, %c0_118] : memref<4x16x64xf32, #tpu.memory_space<vmem>>, vector<4x1x64xf32>
    %118 = vector.shape_cast %117 : vector<4x1x64xf32> to vector<4x64xf32>
    %c13_119 = arith.constant 13 : index
    %c0_120 = arith.constant 0 : index
    %c0_121 = arith.constant 0 : index
    %119 = vector.load %arg2[%c13_119, %c0_120, %c0_121] : memref<16x64x16xf32, #tpu.memory_space<vmem>>, vector<1x64x16xf32>
    %120 = vector.shape_cast %119 : vector<1x64x16xf32> to vector<64x16xf32>
    %cst_122 = arith.constant dense<0.000000e+00> : vector<4x16xf32>
    %121 = tpu.matmul %118, %120, %cst_122 {dimension_numbers = #tpu.dot_dimension_numbers<[1], [0], [0], [1], [0, 0, 1, 1], [], []>} : vector<4x64xf32>, vector<64x16xf32>, vector<4x16xf32> -> vector<4x16xf32>
    %c0_123 = arith.constant 0 : index
    %c208 = arith.constant 208 : index
    %122 = vector.load %arg3[%c0_123, %c208] : memref<1x256xf32, #tpu.memory_space<vmem>>, vector<1x16xf32>
    %123 = vector.broadcast %122 : vector<1x16xf32> to vector<4x16xf32>
    %124 = arith.addf %121, %123 : vector<4x16xf32>
    %c0_124 = arith.constant 0 : index
    %c208_125 = arith.constant 208 : index
    %125 = vector.load %arg4[%c0_124, %c208_125] : memref<4x256xf32, #tpu.memory_space<vmem>>, vector<4x16xf32>
    tpu.vector_store %arg4[%c0_124, %c208_125], %124 {strides = array<i32>} : memref<4x256xf32, #tpu.memory_space<vmem>>, vector<4x16xf32>,
    %c0_126 = arith.constant 0 : index
    %c14 = arith.constant 14 : index
    %c0_127 = arith.constant 0 : index
    %126 = vector.load %arg1[%c0_126, %c14, %c0_127] : memref<4x16x64xf32, #tpu.memory_space<vmem>>, vector<4x1x64xf32>
    %127 = vector.shape_cast %126 : vector<4x1x64xf32> to vector<4x64xf32>
    %c14_128 = arith.constant 14 : index
    %c0_129 = arith.constant 0 : index
    %c0_130 = arith.constant 0 : index
    %128 = vector.load %arg2[%c14_128, %c0_129, %c0_130] : memref<16x64x16xf32, #tpu.memory_space<vmem>>, vector<1x64x16xf32>
    %129 = vector.shape_cast %128 : vector<1x64x16xf32> to vector<64x16xf32>
    %cst_131 = arith.constant dense<0.000000e+00> : vector<4x16xf32>
    %130 = tpu.matmul %127, %129, %cst_131 {dimension_numbers = #tpu.dot_dimension_numbers<[1], [0], [0], [1], [0, 0, 1, 1], [], []>} : vector<4x64xf32>, vector<64x16xf32>, vector<4x16xf32> -> vector<4x16xf32>
    %c0_132 = arith.constant 0 : index
    %c224 = arith.constant 224 : index
    %131 = vector.load %arg3[%c0_132, %c224] : memref<1x256xf32, #tpu.memory_space<vmem>>, vector<1x16xf32>
    %132 = vector.broadcast %131 : vector<1x16xf32> to vector<4x16xf32>
    %133 = arith.addf %130, %132 : vector<4x16xf32>
    %c0_133 = arith.constant 0 : index
    %c224_134 = arith.constant 224 : index
    %134 = vector.load %arg4[%c0_133, %c224_134] : memref<4x256xf32, #tpu.memory_space<vmem>>, vector<4x16xf32>
    tpu.vector_store %arg4[%c0_133, %c224_134], %133 {strides = array<i32>} : memref<4x256xf32, #tpu.memory_space<vmem>>, vector<4x16xf32>,
    %c0_135 = arith.constant 0 : index
    %c15 = arith.constant 15 : index
    %c0_136 = arith.constant 0 : index
    %135 = vector.load %arg1[%c0_135, %c15, %c0_136] : memref<4x16x64xf32, #tpu.memory_space<vmem>>, vector<4x1x64xf32>
    %136 = vector.shape_cast %135 : vector<4x1x64xf32> to vector<4x64xf32>
    %c15_137 = arith.constant 15 : index
    %c0_138 = arith.constant 0 : index
    %c0_139 = arith.constant 0 : index
    %137 = vector.load %arg2[%c15_137, %c0_138, %c0_139] : memref<16x64x16xf32, #tpu.memory_space<vmem>>, vector<1x64x16xf32>
    %138 = vector.shape_cast %137 : vector<1x64x16xf32> to vector<64x16xf32>
    %cst_140 = arith.constant dense<0.000000e+00> : vector<4x16xf32>
    %139 = tpu.matmul %136, %138, %cst_140 {dimension_numbers = #tpu.dot_dimension_numbers<[1], [0], [0], [1], [0, 0, 1, 1], [], []>} : vector<4x64xf32>, vector<64x16xf32>, vector<4x16xf32> -> vector<4x16xf32>
    %c0_141 = arith.constant 0 : index
    %c240 = arith.constant 240 : index
    %140 = vector.load %arg3[%c0_141, %c240] : memref<1x256xf32, #tpu.memory_space<vmem>>, vector<1x16xf32>
    %141 = vector.broadcast %140 : vector<1x16xf32> to vector<4x16xf32>
    %142 = arith.addf %139, %141 : vector<4x16xf32>
    %c0_142 = arith.constant 0 : index
    %c240_143 = arith.constant 240 : index
    %143 = vector.load %arg4[%c0_142, %c240_143] : memref<4x256xf32, #tpu.memory_space<vmem>>, vector<4x16xf32>
    tpu.vector_store %arg4[%c0_142, %c240_143], %142 {strides = array<i32>} : memref<4x256xf32, #tpu.memory_space<vmem>>, vector<4x16xf32>,
    return
  }
  func.func @transform_0(%arg0: i32) -> (i32, i32, i32) {
    %c0_i32 = arith.constant 0 : i32
    %c0_i32_0 = arith.constant 0 : i32
    %c0_i32_1 = arith.constant 0 : i32
    return %c0_i32, %arg0, %c0_i32_0 : i32, i32, i32
  }
  func.func @transform_1(%arg0: i32) -> (i32, i32, i32) {
    %c0_i32 = arith.constant 0 : i32
    %c0_i32_0 = arith.constant 0 : i32
    %c0_i32_1 = arith.constant 0 : i32
    return %arg0, %c0_i32, %c0_i32_0 : i32, i32, i32
  }
  func.func @transform_2(%arg0: i32) -> (i32, i32) {
    %c0_i32 = arith.constant 0 : i32
    %c0_i32_0 = arith.constant 0 : i32
    return %c0_i32, %arg0 : i32, i32
  }
  func.func @transform_3(%arg0: i32) -> (i32, i32) {
    %c0_i32 = arith.constant 0 : i32
    %c0_i32_0 = arith.constant 0 : i32
    return %c0_i32, %arg0 : i32, i32
  }
}

</mosaic_0001>

<bundles_post_ra>
// kernel: tpu_custom_call.1
= control target key start
LH: loop header
LB: loop body
LE: loop exit
PB: predicated region body
PF: predicated region fallthrough
CT: control target
= control target key end

     0   :  { %8 = vsyncpa [#allocation4], 0  ;;  %s3646_s0 = inlined_call_operand.vmem [shape: f32[4,32,64], index: 0, kind: input, shape index: {}]   ;;  %s3647_s1 = inlined_call_operand.vmem [shape: f32[32,64,16], index: 1, kind: input, shape index: {}]   ;;  %s3648_s2 = inlined_call_operand.vmem [shape: f32[1,512], index: 2, kind: input, shape index: {}]   ;;  %s3649_s3 = inlined_call_operand.hbm [shape: f32[4,512], index: 3, kind: output, shape index: {}]  }
   0x1   :  { %10 = vsyncpa [#allocation4 + $0x1], 0  ;;  %s3079_s12 = smov 0   ;;  %s3081_s13 = smov 0  }
   0x2   :  { %s3083_s14 = smov 0   ;;  %s3085_s15 = smov 0  }
   0x3 LB: > { %s3100_s16 = sadd.s32 4294967295, %s3046_s15   ;;  %s2122_s17 = sadd.s32 4294967294, %s3046_s15   ;;  %s3046_s15 = sphi %s3085_s15, %s3656_s15   ;;  %s3042_s14 = sphi %s3083_s14, %s3655_s14   ;;  %s3038_s13 = sphi %s3081_s13, %s3654_s13   ;;  %s3034_s12 = sphi %s3079_s12, %s3653_s12  }
   0x4   : > { %s3104_s18 = sadd.s32 1, %s3046_s15   ;;  %s23_s19 = sadd.s32 1, %s3042_s14 }
   0x5   : > { %s20_s20 = ssub.s32 %s3046_s15, %s3104_s18  ;;  %p30_p0 = scmp.ne.s32.totalorder %s3042_s14, %s3038_s13 }
   0x6   : > { %p21_p1 = scmp.eq.s32.totalorder %s20_s20, 0  ;;  %p31_p2 = scmp.eq.s32.totalorder %s3046_s15, 0 }
   0x7   : > { %p112_p3 = scmp.eq.s32.totalorder %s3100_s16, 1  ;;  %p117_p4 = scmp.ne.s32.totalorder %s3038_s13, %s3034_s12 }
   0x8   : > { %s3116_s21 = scalar_select %p21_p1, %s3042_s14, %s23_s19  }
   0x9   : > { %p32_p5 = por %p31_p2, %p30_p0  ;;  %p3118_p6 = por %p112_p3, %p30_p0 }
   0xa   : > { %p118_p7 = scmp.eq.s32.totalorder %s2122_s17, 1  ;;  %p2124_p9 = scmp.ge.s32.totalorder %s3046_s15, 2 }
   0xc   : > { %p3122_p8 = por %p118_p7, %p117_p4  ;;  %134 = sbr.rel (%p2124_p9) target bundleno = 27 (0x1b), region = 16 }
  0x13   : > { %137 = sbr.rel (!%p32_p5) target bundleno = 27 (0x1b), region = 20  ;;  %s139_s24 = sand.u32 (%p32_p5), 1, %s3042_s14  }
  0x14   : > { %s2292_s25 = sshll.u32 (%p32_p5), %s3046_s15, 4  ;;  %s2125_s26 = sshll.u32 (%p32_p5), %s139_s24, 6 }
  0x15   : > { %s144_s29 = scalar_lea.vmem (%p32_p5), %s3646_s0, %s2292_s25  ;;  %s141_s30 = scalar_lea.vmem (%p32_p5), [#allocation2], %s2125_s26 }
  0x16   : > { %v186_v0 = vld [vmem:[%s144_s29] sm:$0xff] (%p32_p5)  ;;  %v188_v1 = vld [vmem:[%s144_s29 + $0x8] sm:$0xff] (%p32_p5) }
  0x17   : > { %v190_v2 = vld [vmem:[%s144_s29 + $0x20] sm:$0xff] (%p32_p5)  ;;  %187 = vst [vmem:[%s141_s30] sm:$0xff] (%p32_p5), %v186_v0  ;;  %189 = vst [vmem:[%s141_s30 + $0x8] sm:$0xff] (%p32_p5), %v188_v1  ;;  %v192_v3 = vld [vmem:[%s144_s29 + $0x28] sm:$0xff] (%p32_p5) }
  0x18   : > { %191 = vst [vmem:[%s141_s30 + $0x10] sm:$0xff] (%p32_p5), %v190_v2  ;;  %v194_v4 = vld [vmem:[%s144_s29 + $0x40] sm:$0xff] (%p32_p5)  ;;  %v196_v5 = vld [vmem:[%s144_s29 + $0x48] sm:$0xff] (%p32_p5)  ;;  %193 = vst [vmem:[%s141_s30 + $0x18] sm:$0xff] (%p32_p5), %v192_v3 }
  0x19   : > { %195 = vst [vmem:[%s141_s30 + $0x20] sm:$0xff] (%p32_p5), %v194_v4  ;;  %197 = vst [vmem:[%s141_s30 + $0x28] sm:$0xff] (%p32_p5), %v196_v5  ;;  %v198_v6 = vld [vmem:[%s144_s29 + $0x60] sm:$0xff] (%p32_p5)  ;;  %v200_v7 = vld [vmem:[%s144_s29 + $0x68] sm:$0xff] (%p32_p5) }
  0x1a   : > { %199 = vst [vmem:[%s141_s30 + $0x30] sm:$0xff] %v198_v6  ;;  %201 = vst [vmem:[%s141_s30 + $0x38] sm:$0xff] %v200_v7 }
  0x1b PF: > { %p2128_p10 = scmp.ge.s32.totalorder %s3046_s15, 1  ;;  %p224_p11 = scmp.lt.s32.totalorder %s3046_s15, 3 }
  0x1d   : > { %p225_p12 = pnand %p2128_p10, %p224_p11 }
  0x1e   : > { %s2131_s4 = sshll.u32 (!%p225_p12), %s3100_s16, 4  ;;  %s3138_s5 = sand.u32 (!%p225_p12), 1, %s3038_s13   ;;  %v3048_v8 = vmov (!%p225_p12), 0.0|0.0   ;;  %vm3049_vm0 = vmmov (!%p225_p12), 0   ;;  %v3050_v9 = vmov (!%p225_p12), 0.0   ;;  %vm302_vm1 = vcmask (!%p225_p12), 1041409  }
  0x1f   : > { %228 = sbr.rel (%p225_p12) target bundleno = 518 (0x206), region = 66  ;;  %2743 = vmatprep.subr.bf16.mxu0 (!%p225_p12), %v3048_v8  ;;  %p266_p13 = scmp.lt.s32.totalorder (!%p225_p12), %s2131_s4, 31  ;;  %2755 = vmatprep.subr.bf16.mxu1 (!%p225_p12), %v3048_v8  ;;  %vm305_vm2 = vcmask (!%p225_p12), 1042434   ;;  %vm308_vm3 = vcmask (!%p225_p12), 1043459   ;;  %vm310_vm4 = vcmask (!%p225_p12), 523264   ;;  %vm383_vm5 = vcmask (!%p225_p12), 125952  }
  0x20   : > { %2455 = vmatprep.mubr.msk.f32.mxu0 (!%p225_p12), %vm3049_vm0, %v3050_v9  ;;  %s2129_s6 = sshll.u32 (!%p225_p12), %s3138_s5, 6  ;;  %2474 = vmatprep.mubr.msk.f32.mxu1 (!%p225_p12), %vm3049_vm0, %v3050_v9  ;;  %s2134_s17 = sshll.u32 (!%p225_p12), %s3100_s16, 1  ;;  %vm493_vm6 = vcmask (!%p225_p12), 257152   ;;  %vm603_vm7 = vcmask (!%p225_p12), 388352   ;;  %vm713_vm8 = vcmask (!%p225_p12), 519552   ;;  %vm823_vm9 = vcmask (!%p225_p12), 650752  }
  0x21   : > { %s3160_s11 = scalar_lea.vmem (!%p225_p12), [#allocation2], %s2129_s6  ;;  %p3277_p0 = scmp.lt.s32.totalorder (!%p225_p12), %s2134_s17, 3  ;;  %vm933_vm10 = vcmask (!%p225_p12), 781952   ;;  %vm1043_vm11 = vcmask (!%p225_p12), 913152   ;;  %vm1153_vm12 = vcmask (!%p225_p12), 1044352  }
  0x22   : > { %v279_v20 = vld [vmem:[%s3160_s11 + $0x10] sm:$0x1] (!%p225_p12)  ;;  %v386_v22 = vld [vmem:[%s3160_s11 + $0x11] sm:$0x1] (!%p225_p12)  ;;  %v280_v28 = vld [vmem:[%s3160_s11 + $0x20] sm:$0x1] (!%p225_p12) }
  0x23   : > { %v301_v29 = vrot.slane (!%p225_p12), %v279_v20, 7  ;;  %v278_v30 = vld [vmem:[%s3160_s11] sm:$0x1] (!%p225_p12)  ;;  %v387_v31 = vld [vmem:[%s3160_s11 + $0x21] sm:$0x1] (!%p225_p12)  ;;  %v408_v32 = vrot.slane (!%p225_p12), %v386_v22, 7 }
  0x24   : > { %v385_v34 = vld [vmem:[%s3160_s11 + $0x1] sm:$0x1] (!%p225_p12)  ;;  %v281_v38 = vld [vmem:[%s3160_s11 + $0x30] sm:$0x1] (!%p225_p12)  ;;  %v304_v39 = vrot.slane (!%p225_p12), %v280_v28, 6  ;;  %v410_v44 = vrot.slane (!%p225_p12), %v387_v31, 6 }
  0x25   : > { %v303_v40 = vsel (!%p225_p12), %vm302_vm1, %v301_v29, %v278_v30  ;;  %v388_v43 = vld [vmem:[%s3160_s11 + $0x31] sm:$0x1] (!%p225_p12)  ;;  %v409_v45 = vsel (!%p225_p12), %vm302_vm1, %v408_v32, %v385_v34  ;;  %v307_v47 = vrot.slane (!%p225_p12), %v281_v38, 5  ;;  %v496_v0 = vld [vmem:[%s3160_s11 + $0x12] sm:$0x1] (!%p225_p12)  ;;  %s3051_s26 = smov (!%p225_p12), 112  }
  0x26   : > { %s3658_s4 = smov (!%p266_p13, %s2131_s4), 31  ;;  %v306_v48 = vsel %vm305_vm2, %v304_v39, %v303_v40  ;;  %v412_v52 = vrot.slane %v388_v43, 5  ;;  %v411_v53 = vsel %vm305_vm2, %v410_v44, %v409_v45  ;;  %v606_v2 = vld [vmem:[%s3160_s11 + $0x13] sm:$0x1]  ;;  %v498_v20 = vld [vmem:[%s3160_s11 + $0x32] sm:$0x1] }
  0x27   : > { %s2293_s7 = sshll.u32 %s3658_s4, 6  ;;  %v309_v56 = vsel %vm308_vm3, %v307_v47, %v306_v48  ;;  %v522_v29 = vrot.slane %v498_v20, 5  ;;  %v826_v48 = vld [vmem:[%s3160_s11 + $0x15] sm:$0x1]  ;;  %s3660_s17 = smov (!%p3277_p0, %s2134_s17), 3 }
  0x28   : > { %s3150_s10 = scalar_lea.vmem %s3647_s1, %s2293_s7  ;;  %v413_v58 = vsel %vm308_vm3, %v412_v52, %v411_v53  ;;  %s3305_s25 = scalar_lea.vmem %s3648_s2, %s3660_s17 }
  0x29   : > { %v282_v10 = vld [vmem:[%s3150_s10] sm:$0xff]  ;;  %v283_v11 = vld [vmem:[%s3150_s10 + $0x8] sm:$0xff]  ;;  %v284_v15 = vld [vmem:[%s3150_s10 + $0x10] sm:$0xff]  ;;  %s3052_s27 = smov 96   ;;  %s3053_s28 = smov 80  }
  0x2a   : > { %v2137_v12 = vld [vmem:[%s3150_s10 + $0x40] sm:$0xff]  ;;  %v2744_v13 = vpack.c.bf16 %v283_v11, %v282_v10  ;;  %v2138_v14 = vld [vmem:[%s3150_s10 + $0x48] sm:$0xff]  ;;  %v285_v16 = vld [vmem:[%s3150_s10 + $0x18] sm:$0xff]  ;;  %v518_v11 = vrot.slane %v496_v0, 7  ;;  %s3054_s29 = smov 64   ;;  %s3055_s30 = smov 48  }
  0x2b   : > { %v2756_v17 = vpack.c.bf16 %v2138_v14, %v2137_v12  ;;  %v2139_v18 = vld [vmem:[%s3150_s10 + $0x50] sm:$0xff]  ;;  %v2140_v19 = vld [vmem:[%s3150_s10 + $0x58] sm:$0xff]  ;;  %v2747_v21 = vpack.c.bf16 %v285_v16, %v284_v15  ;;  %v286_v24 = vld [vmem:[%s3150_s10 + $0x20] sm:$0xff]  ;;  %v628_v14 = vrot.slane %v606_v2, 7  ;;  %s3056_s4 = smov 32   ;;  %s3057_s6 = smov 16  }
  0x2c   : > { %2745 = vmatpush3.bf16.msra.mxu0 %v2744_v13  ;;  %v2759_v23 = vpack.c.bf16 %v2140_v19, %v2139_v18  ;;  %v287_v25 = vld [vmem:[%s3150_s10 + $0x28] sm:$0xff]  ;;  %v2141_v26 = vld [vmem:[%s3150_s10 + $0x60] sm:$0xff]  ;;  %v288_v36 = vld [vmem:[%s3150_s10 + $0x30] sm:$0xff]  ;;  %s2130_s7 = sshll.u32 %s3138_s5, 3  ;;  %s2294_s9 = sshll.u32 %s3100_s16, 7 }
  0x2d   : > { %2746 = vmatprep.subr.bf16.mxu0 %v3048_v8  ;;  %2757 = vmatpush3.bf16.msra.mxu1 %v2756_v17  ;;  %v2142_v27 = vld [vmem:[%s3150_s10 + $0x68] sm:$0xff]  ;;  %v2750_v33 = vpack.c.bf16 %v287_v25, %v286_v24  ;;  %v289_v37 = vld [vmem:[%s3150_s10 + $0x38] sm:$0xff]  ;;  %v2143_v41 = vld [vmem:[%s3150_s10 + $0x70] sm:$0xff]  ;;  %s3548_s8 = scalar_lea.vmem [#allocation3], %s2130_s7  ;;  %s3600_s19 = scalar_lea.hbm %s3649_s3, %s2294_s9 }
  0x2e   : > { %2758 = vmatprep.subr.bf16.mxu1 %v3048_v8  ;;  %v2762_v35 = vpack.c.bf16 %v2142_v27, %v2141_v26  ;;  %v2144_v42 = vld [vmem:[%s3150_s10 + $0x78] sm:$0xff]  ;;  %v2753_v46 = vpack.c.bf16 %v289_v37, %v288_v36  ;;  %v2147_v50 = vld [vmem:[%s3150_s10 + $0x80] sm:$0xff]  ;;  %v2148_v51 = vld [vmem:[%s3150_s10 + $0x88] sm:$0xff]  ;;  %s2022_s20 = scalar_lea.sflag [#allocation4], %s3138_s5  ;;  %s3058_s16 = smov [#allocation3]  }
  0x2f   : > { %v2765_v49 = vpack.c.bf16 %v2144_v42, %v2143_v41  ;;  %v2157_v54 = vld [vmem:[%s3150_s10 + $0xc0] sm:$0xff]  ;;  %v2158_v55 = vld [vmem:[%s3150_s10 + $0xc8] sm:$0xff]  ;;  %v2768_v57 = vpack.c.bf16 %v2148_v51, %v2147_v50  ;;  %v2149_v60 = vld [vmem:[%s3150_s10 + $0x90] sm:$0xff] }
  0x30   : > { %2748 = vmatpush3.bf16.msra.mxu0 %v2747_v21  ;;  %v2780_v59 = vpack.c.bf16 %v2158_v55, %v2157_v54  ;;  %v2150_v61 = vld [vmem:[%s3150_s10 + $0x98] sm:$0xff]  ;;  %v2159_v62 = vld [vmem:[%s3150_s10 + $0xd0] sm:$0xff]  ;;  %v2151_v4 = vld [vmem:[%s3150_s10 + $0xa0] sm:$0xff] }
  0x31   : > { %2749 = vmatprep.subr.bf16.mxu0 %v3048_v8  ;;  %2760 = vmatpush3.bf16.msra.mxu1 %v2759_v23  ;;  %v2160_v63 = vld [vmem:[%s3150_s10 + $0xd8] sm:$0xff]  ;;  %v2771_v1 = vpack.c.bf16 %v2150_v61, %v2149_v60  ;;  %v2152_v5 = vld [vmem:[%s3150_s10 + $0xa8] sm:$0xff]  ;;  %v2161_v6 = vld [vmem:[%s3150_s10 + $0xe0] sm:$0xff] }
  0x32   : > { %2761 = vmatprep.subr.bf16.mxu1 %v3048_v8  ;;  %v2783_v3 = vpack.c.bf16 %v2160_v63, %v2159_v62  ;;  %v2162_v7 = vld [vmem:[%s3150_s10 + $0xe8] sm:$0xff]  ;;  %v497_v10 = vld [vmem:[%s3160_s11 + $0x22] sm:$0x1]  ;;  %v607_v13 = vld [vmem:[%s3160_s11 + $0x23] sm:$0x1]  ;;  %v2774_v15 = vpack.c.bf16 %v2152_v5, %v2151_v4 }
  0x33   : > { %v495_v12 = vld [vmem:[%s3160_s11 + $0x2] sm:$0x1]  ;;  %v605_v16 = vld [vmem:[%s3160_s11 + $0x3] sm:$0x1]  ;;  %v2786_v17 = vpack.c.bf16 %v2162_v7, %v2161_v6  ;;  %v2153_v18 = vld [vmem:[%s3150_s10 + $0xb0] sm:$0xff]  ;;  %v520_v21 = vrot.slane %v497_v10, 6 }
  0x34   : > { %2751 = vmatpush3.bf16.msra.mxu0 %v2750_v33  ;;  %v2154_v19 = vld [vmem:[%s3150_s10 + $0xb8] sm:$0xff]  ;;  %v519_v22 = vsel %vm302_vm1, %v518_v11, %v495_v12  ;;  %v2163_v23 = vld [vmem:[%s3150_s10 + $0xf0] sm:$0xff]  ;;  %v630_v26 = vrot.slane %v607_v13, 6  ;;  %v629_v27 = vsel %vm302_vm1, %v628_v14, %v605_v16  ;;  %v2167_v32 = vld [vmem:[%s3150_s10 + $0x100] sm:$0xff] }
  0x35   : > { %2752 = vmatprep.subr.bf16.mxu0 %v3048_v8  ;;  %2763 = vmatpush3.bf16.msra.mxu1 %v2762_v35  ;;  %v2164_v24 = vld [vmem:[%s3150_s10 + $0xf8] sm:$0xff]  ;;  %v608_v25 = vld [vmem:[%s3160_s11 + $0x33] sm:$0x1]  ;;  %v2777_v28 = vpack.c.bf16 %v2154_v19, %v2153_v18  ;;  %v521_v30 = vsel %vm305_vm2, %v520_v21, %v519_v22  ;;  %v2168_v33 = vld [vmem:[%s3150_s10 + $0x108] sm:$0xff] }
  0x36   : > { %2764 = vmatprep.subr.bf16.mxu1 %v3048_v8  ;;  %v2789_v31 = vpack.c.bf16 %v2164_v24, %v2163_v23  ;;  %v632_v34 = vrot.slane %v608_v25, 5  ;;  %v631_v35 = vsel %vm305_vm2, %v630_v26, %v629_v27  ;;  %v2177_v36 = vld [vmem:[%s3150_s10 + $0x140] sm:$0xff]  ;;  %v2178_v37 = vld [vmem:[%s3150_s10 + $0x148] sm:$0xff]  ;;  %v523_v38 = vsel %vm308_vm3, %v522_v29, %v521_v30  ;;  %v2169_v42 = vld [vmem:[%s3150_s10 + $0x110] sm:$0xff] }
  0x37   : > { %v2792_v39 = vpack.c.bf16 %v2168_v33, %v2167_v32  ;;  %v2804_v41 = vpack.c.bf16 %v2178_v37, %v2177_v36  ;;  %v2170_v43 = vld [vmem:[%s3150_s10 + $0x118] sm:$0xff]  ;;  %v2179_v44 = vld [vmem:[%s3150_s10 + $0x150] sm:$0xff]  ;;  %v2171_v50 = vld [vmem:[%s3150_s10 + $0x120] sm:$0xff] }
  0x38   : > { %2754 = vmatpush3.bf16.msra.mxu0 %v2753_v46  ;;  %v633_v40 = vsel %vm308_vm3, %v632_v34, %v631_v35  ;;  %v2180_v45 = vld [vmem:[%s3150_s10 + $0x158] sm:$0xff]  ;;  %v716_v46 = vld [vmem:[%s3160_s11 + $0x14] sm:$0x1]  ;;  %v2795_v47 = vpack.c.bf16 %v2170_v43, %v2169_v42  ;;  %v2172_v51 = vld [vmem:[%s3150_s10 + $0x128] sm:$0xff] }
  0x39   : > { %2766 = vmatpush3.bf16.msra.mxu1 %v2765_v49  ;;  %2767 = vmatprep.subr.bf16.mxu0 %v3048_v8  ;;  %v2807_v49 = vpack.c.bf16 %v2180_v45, %v2179_v44  ;;  %v2181_v52 = vld [vmem:[%s3150_s10 + $0x160] sm:$0xff]  ;;  %v2182_v53 = vld [vmem:[%s3150_s10 + $0x168] sm:$0xff]  ;;  %v738_v55 = vrot.slane %v716_v46, 7  ;;  %v2173_v62 = vld [vmem:[%s3150_s10 + $0x130] sm:$0xff] }
  0x3a   : > { %2779 = vmatprep.subr.bf16.mxu1 %v3048_v8  ;;  %v717_v54 = vld [vmem:[%s3160_s11 + $0x24] sm:$0x1]  ;;  %v825_v60 = vld [vmem:[%s3160_s11 + $0x5] sm:$0x1]  ;;  %v2810_v61 = vpack.c.bf16 %v2182_v53, %v2181_v52  ;;  %v2174_v63 = vld [vmem:[%s3150_s10 + $0x138] sm:$0xff] }
  0x3b   : > { %2456 = vmatmul.mubr.msk.f32.vlgmr.msra.gmra.mrb[0].mxu0 %vm310_vm4, %v309_v56  ;;  %v715_v56 = vld [vmem:[%s3160_s11 + $0x4] sm:$0x1]  ;;  %v718_v0 = vld [vmem:[%s3160_s11 + $0x34] sm:$0x1]  ;;  %v2184_v4 = vld [vmem:[%s3150_s10 + $0x178] sm:$0xff]  ;;  %v2801_v10 = vpack.c.bf16 %v2174_v63, %v2173_v62 }
  0x3c   : > { %2769 = vmatpush3.bf16.msra.mxu0 %v2768_v57  ;;  %2475 = vmatmul.mubr.msk.f32.vlgmr.msra.gmra.mrb[0].mxu1 %vm310_vm4, %v413_v58  ;;  %v827_v57 = vld [vmem:[%s3160_s11 + $0x25] sm:$0x1]  ;;  %v848_v58 = vrot.slane %v826_v48, 7  ;;  %v739_v2 = vsel %vm302_vm1, %v738_v55, %v715_v56  ;;  %v828_v5 = vld [vmem:[%s3160_s11 + $0x35] sm:$0x1]  ;;  %v742_v11 = vrot.slane %v718_v0, 5 }
  0x3d   : > { %2770 = vmatprep.subr.bf16.mxu0 %v3048_v8  ;;  %2781 = vmatpush3.bf16.msra.mxu1 %v2780_v59  ;;  %v2798_v59 = vpack.c.bf16 %v2172_v51, %v2171_v50  ;;  %v850_v6 = vrot.slane %v827_v57, 6  ;;  %v2187_v14 = vld [vmem:[%s3150_s10 + $0x180] sm:$0xff]  ;;  %v852_v16 = vrot.slane %v828_v5, 5  ;;  %v2198_v19 = vld [vmem:[%s3150_s10 + $0x1c8] sm:$0xff]  ;;  %v2189_v24 = vld [vmem:[%s3150_s10 + $0x190] sm:$0xff] }
  0x3e   : > { %2782 = vmatprep.subr.bf16.mxu1 %v3048_v8  ;;  %2493 = vmatprep.mubr.msk.f32.mxu0 %vm3049_vm0, %v3050_v9  ;;  %v849_v7 = vsel %vm302_vm1, %v848_v58, %v825_v60  ;;  %v2197_v18 = vld [vmem:[%s3150_s10 + $0x1c0] sm:$0xff]  ;;  %v2190_v25 = vld [vmem:[%s3150_s10 + $0x198] sm:$0xff]  ;;  %v2199_v26 = vld [vmem:[%s3150_s10 + $0x1d0] sm:$0xff] }
  0x3f   : > { %2512 = vmatprep.mubr.msk.f32.mxu1 %vm3049_vm0, %v3050_v9  ;;  %v2828_v23 = vpack.c.bf16 %v2198_v19, %v2197_v18  ;;  %v2200_v27 = vld [vmem:[%s3150_s10 + $0x1d8] sm:$0xff]  ;;  %v2819_v29 = vpack.c.bf16 %v2190_v25, %v2189_v24  ;;  %v1046_v30 = vld [vmem:[%s3160_s11 + $0x17] sm:$0x1]  ;;  %v2191_v32 = vld [vmem:[%s3150_s10 + $0x1a0] sm:$0xff] }
  0x40   : > { %2772 = vmatpush3.bf16.msra.mxu0 %v2771_v1  ;;  %v740_v1 = vrot.slane %v717_v54, 6  ;;  %v2192_v33 = vld [vmem:[%s3150_s10 + $0x1a8] sm:$0xff]  ;;  %v2201_v34 = vld [vmem:[%s3150_s10 + $0x1e0] sm:$0xff]  ;;  %v2193_v45 = vld [vmem:[%s3150_s10 + $0x1b0] sm:$0xff] }
  0x41   : > { %2773 = vmatprep.subr.bf16.mxu0 %v3048_v8  ;;  %2784 = vmatpush3.bf16.msra.mxu1 %v2783_v3  ;;  %v2183_v3 = vld [vmem:[%s3150_s10 + $0x170] sm:$0xff]  ;;  %v2202_v35 = vld [vmem:[%s3150_s10 + $0x1e8] sm:$0xff]  ;;  %v937_v36 = vld [vmem:[%s3160_s11 + $0x26] sm:$0x1] }
  0x42   : > { %2785 = vmatprep.subr.bf16.mxu1 %v3048_v8  ;;  %v741_v12 = vsel %vm305_vm2, %v740_v1, %v739_v2  ;;  %v2813_v13 = vpack.c.bf16 %v2184_v4, %v2183_v3  ;;  %v1045_v42 = vld [vmem:[%s3160_s11 + $0x7] sm:$0x1]  ;;  %v3319_v43 = vld [vmem:[%s3305_s25] ss:$0 sm:$0xff]  ;;  %v2834_v44 = vpack.c.bf16 %v2202_v35, %v2201_v34  ;;  %v2194_v46 = vld [vmem:[%s3150_s10 + $0x1b8] sm:$0xff]  ;;  %v960_v48 = vrot.slane %v937_v36, 6 }
  0x43   : > { %v743_v20 = vsel %vm308_vm3, %v742_v11, %v741_v12  ;;  %v2203_v50 = vld [vmem:[%s3150_s10 + $0x1f0] sm:$0xff]  ;;  %v2204_v51 = vld [vmem:[%s3150_s10 + $0x1f8] sm:$0xff]  ;;  %414 = vrot.lane.b32.xlu0 %v3319_v43, %s3051_s26  ;;  %524 = vrot.lane.b32.xlu1 %v3319_v43, %s3052_s27  ;;  %v2825_v55 = vpack.c.bf16 %v2194_v46, %v2193_v45 }
  0x44   : > { %2775 = vmatpush3.bf16.msra.mxu0 %v2774_v15  ;;  %v2188_v15 = vld [vmem:[%s3150_s10 + $0x188] sm:$0xff]  ;;  %v1048_v52 = vld [vmem:[%s3160_s11 + $0x37] sm:$0x1]  ;;  %v2837_v58 = vpack.c.bf16 %v2204_v51, %v2203_v50  ;;  %v3340_v62 = vld [vmem:[%s3305_s25 + $0x1] ss:$0 sm:$0xff]  ;;  %s2988_s25 = sshll.u32 %s3058_s16, 4  ;;  %s2989_s25 = int_to_ptr.vmem [resolvable:$false] %s2988_s25 }
  0x45   : > { %2776 = vmatprep.subr.bf16.mxu0 %v3048_v8  ;;  %2787 = vmatpush3.bf16.msra.mxu1 %v2786_v17  ;;  %v851_v17 = vsel %vm305_vm2, %v850_v6, %v849_v7  ;;  %v2816_v21 = vpack.c.bf16 %v2188_v15, %v2187_v14  ;;  %v2208_v60 = vld [vmem:[%s3150_s10 + $0x208] sm:$0xff]  ;;  %v2217_v0 = vld [vmem:[%s3150_s10 + $0x240] sm:$0xff]  ;;  %v2209_v6 = vld [vmem:[%s3150_s10 + $0x210] sm:$0xff] }
  0x46   : > { %2788 = vmatprep.subr.bf16.mxu1 %v3048_v8  ;;  %v853_v22 = vsel %vm308_vm3, %v852_v16, %v851_v17  ;;  %v2218_v1 = vld [vmem:[%s3150_s10 + $0x248] sm:$0xff]  ;;  %v2210_v7 = vld [vmem:[%s3150_s10 + $0x218] sm:$0xff]  ;;  %v2211_v16 = vld [vmem:[%s3150_s10 + $0x220] sm:$0xff] }
  0x47   : > { %1287 = vrot.lane.b32.xlu0 %v3340_v62, %s3051_s26  ;;  %1396 = vrot.lane.b32.xlu1 %v3340_v62, %s3052_s27  ;;  %v2852_v5 = vpack.c.bf16 %v2218_v1, %v2217_v0  ;;  %v2220_v11 = vld [vmem:[%s3150_s10 + $0x258] sm:$0xff]  ;;  %v2212_v17 = vld [vmem:[%s3150_s10 + $0x228] sm:$0xff] }
  0x48   : > { %2778 = vmatpush3.bf16.msra.mxu0 %v2777_v28  ;;  %v936_v28 = vld [vmem:[%s3160_s11 + $0x16] sm:$0x1]  ;;  %v1156_v12 = vld [vmem:[%s3160_s11 + $0x18] sm:$0x1]  ;;  %v1259_v14 = vld [vmem:[%s3160_s11 + $0x19] sm:$0x1]  ;;  %v2846_v25 = vpack.c.bf16 %v2212_v17, %v2211_v16 }
  0x49   : > { %2790 = vmatpush3.bf16.msra.mxu1 %v2789_v31  ;;  %2791 = vmatprep.subr.bf16.mxu0 %v3048_v8  ;;  %v2831_v31 = vpack.c.bf16 %v2200_v27, %v2199_v26  ;;  %v958_v37 = vrot.slane %v936_v28, 7  ;;  %v2221_v18 = vld [vmem:[%s3150_s10 + $0x260] sm:$0xff]  ;;  %v2222_v19 = vld [vmem:[%s3150_s10 + $0x268] sm:$0xff]  ;;  %v1281_v24 = vrot.slane %v1259_v14, 7  ;;  %v2213_v28 = vld [vmem:[%s3150_s10 + $0x230] sm:$0xff] }
  0x4a   : > { %2803 = vmatprep.subr.bf16.mxu1 %v3048_v8  ;;  %v1258_v26 = vld [vmem:[%s3160_s11 + $0x9] sm:$0x1]  ;;  %v2858_v27 = vpack.c.bf16 %v2222_v19, %v2221_v18  ;;  %v2224_v34 = vld [vmem:[%s3150_s10 + $0x278] sm:$0xff]  ;;  %v2241_v0 = vld [vmem:[%s3150_s10 + $0x2e0] sm:$0xff] }
  0x4b   : > { %2494 = vmatmul.mubr.msk.f32.vlgmr.msra.gmra.mrb[2].mxu0 %vm310_vm4, %v523_v38  ;;  %v935_v38 = vld [vmem:[%s3160_s11 + $0x6] sm:$0x1]  ;;  %634 = vrot.lane.b32.xlu0 %v3319_v43, %s3053_s28  ;;  %v1261_v35 = vld [vmem:[%s3160_s11 + $0x39] sm:$0x1]  ;;  %v2242_v1 = vld [vmem:[%s3150_s10 + $0x2e8] sm:$0xff] }
  0x4c   : > { %2793 = vmatpush3.bf16.msra.mxu0 %v2792_v39  ;;  %2513 = vmatmul.mubr.msk.f32.vlgmr.msra.gmra.mrb[2].mxu1 %vm310_vm4, %v633_v40  ;;  %v1047_v39 = vld [vmem:[%s3160_s11 + $0x27] sm:$0x1]  ;;  %v1068_v40 = vrot.slane %v1046_v30, 7  ;;  %v1158_v30 = vld [vmem:[%s3160_s11 + $0x38] sm:$0x1]  ;;  %v1285_v45 = vrot.slane %v1261_v35, 5 }
  0x4d   : > { %2794 = vmatprep.subr.bf16.mxu0 %v3048_v8  ;;  %2805 = vmatpush3.bf16.msra.mxu1 %v2804_v41  ;;  %v2822_v41 = vpack.c.bf16 %v2192_v33, %v2191_v32  ;;  %v1070_v53 = vrot.slane %v1047_v39, 6  ;;  %v2223_v33 = vld [vmem:[%s3150_s10 + $0x270] sm:$0xff]  ;;  %v1183_v39 = vrot.slane %v1158_v30, 5  ;;  %v1370_v14 = vld [vmem:[%s3160_s11 + $0x3a] sm:$0x1]  ;;  %v2257_v30 = vld [vmem:[%s3150_s10 + $0x340] sm:$0xff] }
  0x4e   : > { %2806 = vmatprep.subr.bf16.mxu1 %v3048_v8  ;;  %2531 = vmatprep.mubr.msk.f32.mxu0 %vm3049_vm0, %v3050_v9  ;;  %v1069_v54 = vsel %vm302_vm1, %v1068_v40, %v1045_v42  ;;  %v2227_v42 = vld [vmem:[%s3150_s10 + $0x280] sm:$0xff]  ;;  %v2243_v17 = vld [vmem:[%s3150_s10 + $0x2f0] sm:$0xff]  ;;  %v2244_v18 = vld [vmem:[%s3150_s10 + $0x2f8] sm:$0xff] }
  0x4f   : > { %2550 = vmatprep.mubr.msk.f32.mxu1 %vm3049_vm0, %v3050_v9  ;;  %v1071_v63 = vsel %vm305_vm2, %v1070_v53, %v1069_v54  ;;  %1505 = vrot.lane.b32.xlu1 %v3340_v62, %s3053_s28  ;;  %v2229_v53 = vld [vmem:[%s3150_s10 + $0x290] sm:$0xff]  ;;  %v2230_v54 = vld [vmem:[%s3150_s10 + $0x298] sm:$0xff] }
  0x50   : > { %2796 = vmatpush3.bf16.msra.mxu0 %v2795_v47  ;;  %v938_v47 = vld [vmem:[%s3160_s11 + $0x36] sm:$0x1]  ;;  %744 = vrot.lane.b32.xlu0 %v3319_v43, %s3054_s29  ;;  %v1479_v19 = vld [vmem:[%s3160_s11 + $0x3b] sm:$0x1] }
  0x51   : > { %2797 = vmatprep.subr.bf16.mxu0 %v3048_v8  ;;  %2808 = vmatpush3.bf16.msra.mxu1 %v2807_v49  ;;  %v959_v49 = vsel %vm302_vm1, %v958_v37, %v935_v38  ;;  %v962_v56 = vrot.slane %v938_v47, 5  ;;  %v1282_v37 = vsel %vm302_vm1, %v1281_v24, %v1258_v26  ;;  %v2237_v47 = vld [vmem:[%s3150_s10 + $0x2c0] sm:$0xff] }
  0x52   : > { %2809 = vmatprep.subr.bf16.mxu1 %v3048_v8  ;;  %v961_v57 = vsel %vm305_vm2, %v960_v48, %v959_v49  ;;  %v2238_v48 = vld [vmem:[%s3150_s10 + $0x2c8] sm:$0xff]  ;;  %v2247_v26 = vld [vmem:[%s3150_s10 + $0x300] sm:$0xff] }
  0x53   : > { %v963_v2 = vsel %vm308_vm3, %v962_v56, %v961_v57  ;;  %1614 = vrot.lane.b32.xlu1 %v3340_v62, %s3054_s29  ;;  %v2240_v56 = vld [vmem:[%s3150_s10 + $0x2d8] sm:$0xff] }
  0x54   : > { %2799 = vmatpush3.bf16.msra.mxu0 %v2798_v59  ;;  %v2207_v59 = vld [vmem:[%s3150_s10 + $0x200] sm:$0xff]  ;;  %854 = vrot.lane.b32.xlu0 %v3319_v43, %s3055_s30  ;;  %v1368_v57 = vld [vmem:[%s3160_s11 + $0x1a] sm:$0x1] }
  0x55   : > { %2800 = vmatprep.subr.bf16.mxu0 %v3048_v8  ;;  %2811 = vmatpush3.bf16.msra.mxu1 %v2810_v61  ;;  %v1072_v61 = vrot.slane %v1048_v52, 5  ;;  %v2840_v3 = vpack.c.bf16 %v2208_v60, %v2207_v59  ;;  %v2876_v52 = vpack.c.bf16 %v2238_v48, %v2237_v47  ;;  %v1477_v59 = vld [vmem:[%s3160_s11 + $0x1b] sm:$0x1]  ;;  %v2261_v47 = vld [vmem:[%s3150_s10 + $0x360] sm:$0xff]  ;;  %v2262_v48 = vld [vmem:[%s3150_s10 + $0x368] sm:$0xff] }
  0x56   : > { %2812 = vmatprep.subr.bf16.mxu1 %v3048_v8 }
  0x57   : > { %v1073_v4 = vsel %vm308_vm3, %v1072_v61, %v1071_v63  ;;  %1723 = vrot.lane.b32.xlu1 %v3340_v62, %s3055_s30  ;;  %v2231_v61 = vld [vmem:[%s3150_s10 + $0x2a0] sm:$0xff]  ;;  %v2232_v63 = vld [vmem:[%s3150_s10 + $0x2a8] sm:$0xff] }
  0x58   : > { %2802 = vmatpush3.bf16.msra.mxu0 %v2801_v10  ;;  %v2219_v10 = vld [vmem:[%s3150_s10 + $0x250] sm:$0xff]  ;;  %964 = vrot.lane.b32.xlu0 %v3319_v43, %s3056_s4 }
  0x59   : > { %2814 = vmatpush3.bf16.msra.mxu1 %v2813_v13  ;;  %2815 = vmatprep.subr.bf16.mxu0 %v3048_v8  ;;  %v2843_v13 = vpack.c.bf16 %v2210_v7, %v2209_v6  ;;  %v2855_v15 = vpack.c.bf16 %v2220_v11, %v2219_v10  ;;  %v1499_v6 = vrot.slane %v1477_v59, 7  ;;  %v2870_v7 = vpack.c.bf16 %v2232_v63, %v2231_v61  ;;  %v1476_v10 = vld [vmem:[%s3160_s11 + $0xb] sm:$0x1]  ;;  %v1588_v59 = vld [vmem:[%s3160_s11 + $0x3c] sm:$0x1]  ;;  %v2263_v63 = vld [vmem:[%s3150_s10 + $0x370] sm:$0xff] }
  0x5a   : > { %2827 = vmatprep.subr.bf16.mxu1 %v3048_v8  ;;  %v2882_v11 = vpack.c.bf16 %v2242_v1, %v2241_v0  ;;  %v2264_v0 = vld [vmem:[%s3150_s10 + $0x378] sm:$0xff] }
  0x5b   : > { %2532 = vmatmul.mubr.msk.f32.vlgmr.msra.gmra.mrb[4].mxu0 %vm310_vm4, %v743_v20  ;;  %v1157_v20 = vld [vmem:[%s3160_s11 + $0x28] sm:$0x1]  ;;  %1832 = vrot.lane.b32.xlu1 %v3340_v62, %s3056_s4  ;;  %v1697_v1 = vld [vmem:[%s3160_s11 + $0x3d] sm:$0x1] }
  0x5c   : > { %2817 = vmatpush3.bf16.msra.mxu0 %v2816_v21  ;;  %2551 = vmatmul.mubr.msk.f32.vlgmr.msra.gmra.mrb[4].mxu1 %vm310_vm4, %v853_v22  ;;  %v1179_v21 = vrot.slane %v1156_v12, 7  ;;  %v1155_v22 = vld [vmem:[%s3160_s11 + $0x8] sm:$0x1]  ;;  %v2233_v12 = vld [vmem:[%s3150_s10 + $0x2b0] sm:$0xff] }
  0x5d   : > { %2818 = vmatprep.subr.bf16.mxu0 %v3048_v8  ;;  %2829 = vmatpush3.bf16.msra.mxu1 %v2828_v23  ;;  %v1260_v23 = vld [vmem:[%s3160_s11 + $0x29] sm:$0x1] }
  0x5e   : > { %2830 = vmatprep.subr.bf16.mxu1 %v3048_v8  ;;  %2569 = vmatprep.mubr.msk.f32.mxu0 %vm3049_vm0, %v3050_v9  ;;  %v1180_v32 = vsel %vm302_vm1, %v1179_v21, %v1155_v22  ;;  %v1283_v36 = vrot.slane %v1260_v23, 6  ;;  %v1500_v21 = vsel %vm302_vm1, %v1499_v6, %v1476_v10  ;;  %v1394_v23 = vrot.slane %v1370_v14, 5  ;;  %v2267_v10 = vld [vmem:[%s3150_s10 + $0x380] sm:$0xff] }
  0x5f   : > { %2588 = vmatprep.mubr.msk.f32.mxu1 %vm3049_vm0, %v3050_v9  ;;  %1074 = vrot.lane.b32.xlu0 %v3319_v43, %s3057_s6  ;;  %v2277_v14 = vld [vmem:[%s3150_s10 + $0x3c0] sm:$0xff] }
  0x60   : > { %2820 = vmatpush3.bf16.msra.mxu0 %v2819_v29  ;;  %v2214_v29 = vld [vmem:[%s3150_s10 + $0x238] sm:$0xff]  ;;  %v1284_v46 = vsel %vm305_vm2, %v1283_v36, %v1282_v37  ;;  %1941 = vrot.lane.b32.xlu1 %v3340_v62, %s3057_s6  ;;  %v2249_v36 = vld [vmem:[%s3150_s10 + $0x310] sm:$0xff] }
  0x61   : > { %2821 = vmatprep.subr.bf16.mxu0 %v3048_v8  ;;  %2832 = vmatpush3.bf16.msra.mxu1 %v2831_v31  ;;  %v1181_v31 = vrot.slane %v1157_v20, 6  ;;  %v2849_v38 = vpack.c.bf16 %v2214_v29, %v2213_v28  ;;  %v1286_v51 = vsel %vm308_vm3, %v1285_v45, %v1284_v46  ;;  %v1503_v28 = vrot.slane %v1479_v19, 5  ;;  %v2250_v37 = vld [vmem:[%s3150_s10 + $0x318] sm:$0xff]  ;;  %v2251_v45 = vld [vmem:[%s3150_s10 + $0x320] sm:$0xff]  ;;  %v2252_v46 = vld [vmem:[%s3150_s10 + $0x328] sm:$0xff] }
  0x62   : > { %2833 = vmatprep.subr.bf16.mxu1 %v3048_v8 }
  0x63   : > { %v1182_v40 = vsel %vm305_vm2, %v1181_v31, %v1180_v32  ;;  %v2258_v31 = vld [vmem:[%s3150_s10 + $0x348] sm:$0xff] }
  0x64   : > { %2823 = vmatpush3.bf16.msra.mxu0 %v2822_v41  ;;  %v2861_v41 = vpack.c.bf16 %v2224_v34, %v2223_v33  ;;  %v1184_v49 = vsel %vm308_vm3, %v1183_v39, %v1182_v40  ;;  %v2900_v35 = vpack.c.bf16 %v2258_v31, %v2257_v30  ;;  %v2260_v39 = vld [vmem:[%s3150_s10 + $0x358] sm:$0xff]  ;;  %v2281_v30 = vld [vmem:[%s3150_s10 + $0x3e0] sm:$0xff]  ;;  %v2282_v31 = vld [vmem:[%s3150_s10 + $0x3e8] sm:$0xff] }
  0x65   : > { %2824 = vmatprep.subr.bf16.mxu0 %v3048_v8  ;;  %2835 = vmatpush3.bf16.msra.mxu1 %v2834_v44  ;;  %v2228_v44 = vld [vmem:[%s3150_s10 + $0x288] sm:$0xff]  ;;  %v1586_v40 = vld [vmem:[%s3160_s11 + $0x1c] sm:$0x1] }
  0x66   : > { %2836 = vmatprep.subr.bf16.mxu1 %v3048_v8  ;;  %v2864_v50 = vpack.c.bf16 %v2228_v44, %v2227_v42  ;;  %v1695_v42 = vld [vmem:[%s3160_s11 + $0x1d] sm:$0x1] }
  0x68   : > { %2826 = vmatpush3.bf16.msra.mxu0 %v2825_v55  ;;  %v2239_v55 = vld [vmem:[%s3150_s10 + $0x2d0] sm:$0xff] }
  0x69   : > { %2838 = vmatpush3.bf16.msra.mxu1 %v2837_v58  ;;  %2839 = vmatprep.subr.bf16.mxu0 %v3048_v8  ;;  %v2867_v58 = vpack.c.bf16 %v2230_v54, %v2229_v53  ;;  %v2879_v60 = vpack.c.bf16 %v2240_v56, %v2239_v55  ;;  %v1717_v53 = vrot.slane %v1695_v42, 7  ;;  %v2894_v54 = vpack.c.bf16 %v2252_v46, %v2251_v45  ;;  %v1694_v55 = vld [vmem:[%s3160_s11 + $0xd] sm:$0x1]  ;;  %v1806_v42 = vld [vmem:[%s3160_s11 + $0x3e] sm:$0x1] }
  0x6a   : > { %2851 = vmatprep.subr.bf16.mxu1 %v3048_v8  ;;  %v2906_v56 = vpack.c.bf16 %v2262_v48, %v2261_v47  ;;  %v2284_v46 = vld [vmem:[%s3150_s10 + $0x3f8] sm:$0xff] }
  0x6b   : > { %2570 = vmatmul.mubr.msk.f32.vlgmr.msra.gmra.mrb[6].mxu0 %vm310_vm4, %v963_v2  ;;  %v1369_v2 = vld [vmem:[%s3160_s11 + $0x2a] sm:$0x1]  ;;  %v1915_v47 = vld [vmem:[%s3160_s11 + $0x3f] sm:$0x1] }
  0x6c   : > { %2841 = vmatpush3.bf16.msra.mxu0 %v2840_v3  ;;  %2589 = vmatmul.mubr.msk.f32.vlgmr.msra.gmra.mrb[6].mxu1 %vm310_vm4, %v1073_v4  ;;  %v1390_v3 = vrot.slane %v1368_v57, 7  ;;  %v1367_v4 = vld [vmem:[%s3160_s11 + $0xa] sm:$0x1]  ;;  %v2253_v57 = vld [vmem:[%s3150_s10 + $0x330] sm:$0xff] }
  0x6d   : > { %2842 = vmatprep.subr.bf16.mxu0 %v3048_v8  ;;  %2853 = vmatpush3.bf16.msra.mxu1 %v2852_v5  ;;  %v1478_v5 = vld [vmem:[%s3160_s11 + $0x2b] sm:$0x1] }
  0x6e   : > { %2854 = vmatprep.subr.bf16.mxu1 %v3048_v8  ;;  %2607 = vmatprep.mubr.msk.f32.mxu0 %vm3049_vm0, %v3050_v9  ;;  %v1391_v16 = vsel %vm302_vm1, %v1390_v3, %v1367_v4  ;;  %v1501_v20 = vrot.slane %v1478_v5, 6  ;;  %v1718_v3 = vsel %vm302_vm1, %v1717_v53, %v1694_v55  ;;  %v1612_v5 = vrot.slane %v1588_v59, 5 }
  0x6f   : > { %2626 = vmatprep.mubr.msk.f32.mxu1 %vm3049_vm0, %v3050_v9 }
  0x70   : > { %2844 = vmatpush3.bf16.msra.mxu0 %v2843_v13  ;;  %v2234_v13 = vld [vmem:[%s3150_s10 + $0x2b8] sm:$0xff]  ;;  %v1502_v29 = vsel %vm305_vm2, %v1501_v20, %v1500_v21  ;;  %v2269_v20 = vld [vmem:[%s3150_s10 + $0x390] sm:$0xff] }
  0x71   : > { %2845 = vmatprep.subr.bf16.mxu0 %v3048_v8  ;;  %2856 = vmatpush3.bf16.msra.mxu1 %v2855_v15  ;;  %v1392_v15 = vrot.slane %v1369_v2, 6  ;;  %v2873_v22 = vpack.c.bf16 %v2234_v13, %v2233_v12  ;;  %v1504_v34 = vsel %vm308_vm3, %v1503_v28, %v1502_v29  ;;  %v1721_v12 = vrot.slane %v1697_v1, 5  ;;  %v2270_v21 = vld [vmem:[%s3150_s10 + $0x398] sm:$0xff]  ;;  %v2271_v28 = vld [vmem:[%s3150_s10 + $0x3a0] sm:$0xff]  ;;  %v2272_v29 = vld [vmem:[%s3150_s10 + $0x3a8] sm:$0xff] }
  0x72   : > { %2857 = vmatprep.subr.bf16.mxu1 %v3048_v8 }
  0x73   : > { %v1393_v24 = vsel %vm305_vm2, %v1392_v15, %v1391_v16  ;;  %v2278_v15 = vld [vmem:[%s3150_s10 + $0x3c8] sm:$0xff] }
  0x74   : > { %2847 = vmatpush3.bf16.msra.mxu0 %v2846_v25  ;;  %v2885_v25 = vpack.c.bf16 %v2244_v18, %v2243_v17  ;;  %v1395_v32 = vsel %vm308_vm3, %v1394_v23, %v1393_v24  ;;  %v2924_v19 = vpack.c.bf16 %v2278_v15, %v2277_v14  ;;  %v2280_v23 = vld [vmem:[%s3150_s10 + $0x3d8] sm:$0xff] }
  0x75   : > { %2848 = vmatprep.subr.bf16.mxu0 %v3048_v8  ;;  %2859 = vmatpush3.bf16.msra.mxu1 %v2858_v27  ;;  %v2248_v27 = vld [vmem:[%s3150_s10 + $0x308] sm:$0xff]  ;;  %v1804_v24 = vld [vmem:[%s3160_s11 + $0x1e] sm:$0x1] }
  0x76   : > { %2860 = vmatprep.subr.bf16.mxu1 %v3048_v8  ;;  %v2888_v33 = vpack.c.bf16 %v2248_v27, %v2247_v26  ;;  %v1913_v26 = vld [vmem:[%s3160_s11 + $0x1f] sm:$0x1] }
  0x78   : > { %2850 = vmatpush3.bf16.msra.mxu0 %v2849_v38  ;;  %v2259_v38 = vld [vmem:[%s3150_s10 + $0x350] sm:$0xff] }
  0x79   : > { %2862 = vmatpush3.bf16.msra.mxu1 %v2861_v41  ;;  %2863 = vmatprep.subr.bf16.mxu0 %v3048_v8  ;;  %v2891_v41 = vpack.c.bf16 %v2250_v37, %v2249_v36  ;;  %v2903_v44 = vpack.c.bf16 %v2260_v39, %v2259_v38  ;;  %v1935_v36 = vrot.slane %v1913_v26, 7  ;;  %v2918_v37 = vpack.c.bf16 %v2272_v29, %v2271_v28  ;;  %v1912_v38 = vld [vmem:[%s3160_s11 + $0xf] sm:$0x1] }
  0x7a   : > { %2875 = vmatprep.subr.bf16.mxu1 %v3048_v8  ;;  %v2930_v39 = vpack.c.bf16 %v2282_v31, %v2281_v30 }
  0x7b   : > { %2608 = vmatmul.mubr.msk.f32.vlgmr.msra.gmra.mrb[8].mxu0 %vm310_vm4, %v1184_v49  ;;  %v1587_v49 = vld [vmem:[%s3160_s11 + $0x2c] sm:$0x1] }
  0x7c   : > { %2865 = vmatpush3.bf16.msra.mxu0 %v2864_v50  ;;  %2627 = vmatmul.mubr.msk.f32.vlgmr.msra.gmra.mrb[8].mxu1 %vm310_vm4, %v1286_v51  ;;  %v1608_v50 = vrot.slane %v1586_v40, 7  ;;  %v1585_v51 = vld [vmem:[%s3160_s11 + $0xc] sm:$0x1]  ;;  %v2273_v40 = vld [vmem:[%s3150_s10 + $0x3b0] sm:$0xff] }
  0x7d   : > { %2866 = vmatprep.subr.bf16.mxu0 %v3048_v8  ;;  %2877 = vmatpush3.bf16.msra.mxu1 %v2876_v52  ;;  %v1696_v52 = vld [vmem:[%s3160_s11 + $0x2d] sm:$0x1] }
  0x7e   : > { %2878 = vmatprep.subr.bf16.mxu1 %v3048_v8  ;;  %2645 = vmatprep.mubr.msk.f32.mxu0 %vm3049_vm0, %v3050_v9  ;;  %v1609_v61 = vsel %vm302_vm1, %v1608_v50, %v1585_v51  ;;  %v1719_v2 = vrot.slane %v1696_v52, 6  ;;  %v1830_v51 = vrot.slane %v1806_v42, 5 }
  0x7f   : > { %2664 = vmatprep.mubr.msk.f32.mxu1 %vm3049_vm0, %v3050_v9 }
  0x80   : > { %2868 = vmatpush3.bf16.msra.mxu0 %v2867_v58  ;;  %v2254_v58 = vld [vmem:[%s3150_s10 + $0x338] sm:$0xff]  ;;  %v1720_v13 = vsel %vm305_vm2, %v1719_v2, %v1718_v3 }
  0x81   : > { %2869 = vmatprep.subr.bf16.mxu0 %v3048_v8  ;;  %2880 = vmatpush3.bf16.msra.mxu1 %v2879_v60  ;;  %v1610_v60 = vrot.slane %v1587_v49, 6  ;;  %v2897_v4 = vpack.c.bf16 %v2254_v58, %v2253_v57  ;;  %v1722_v18 = vsel %vm308_vm3, %v1721_v12, %v1720_v13  ;;  %v1936_v49 = vsel %vm302_vm1, %v1935_v36, %v1912_v38 }
  0x82   : > { %2881 = vmatprep.subr.bf16.mxu1 %v3048_v8 }
  0x83   : > { %v1611_v6 = vsel %vm305_vm2, %v1610_v60, %v1609_v61 }
  0x84   : > { %2871 = vmatpush3.bf16.msra.mxu0 %v2870_v7  ;;  %v2909_v7 = vpack.c.bf16 %v2264_v0, %v2263_v63  ;;  %v1613_v16 = vsel %vm308_vm3, %v1612_v5, %v1611_v6 }
  0x85   : > { %2872 = vmatprep.subr.bf16.mxu0 %v3048_v8  ;;  %2883 = vmatpush3.bf16.msra.mxu1 %v2882_v11  ;;  %v2268_v11 = vld [vmem:[%s3150_s10 + $0x388] sm:$0xff] }
  0x86   : > { %2884 = vmatprep.subr.bf16.mxu1 %v3048_v8  ;;  %v2912_v17 = vpack.c.bf16 %v2268_v11, %v2267_v10 }
  0x88   : > { %2874 = vmatpush3.bf16.msra.mxu0 %v2873_v22  ;;  %v2279_v22 = vld [vmem:[%s3150_s10 + $0x3d0] sm:$0xff] }
  0x89   : > { %2886 = vmatpush3.bf16.msra.mxu1 %v2885_v25  ;;  %2887 = vmatprep.subr.bf16.mxu0 %v3048_v8  ;;  %v2915_v25 = vpack.c.bf16 %v2270_v21, %v2269_v20  ;;  %v2927_v27 = vpack.c.bf16 %v2280_v23, %v2279_v22 }
  0x8a   : > { %2899 = vmatprep.subr.bf16.mxu1 %v3048_v8 }
  0x8b   : > { %2646 = vmatmul.mubr.msk.f32.vlgmr.msra.gmra.mrb[10].mxu0 %vm310_vm4, %v1395_v32  ;;  %v1805_v32 = vld [vmem:[%s3160_s11 + $0x2e] sm:$0x1] }
  0x8c   : > { %2889 = vmatpush3.bf16.msra.mxu0 %v2888_v33  ;;  %2665 = vmatmul.mubr.msk.f32.vlgmr.msra.gmra.mrb[10].mxu1 %vm310_vm4, %v1504_v34  ;;  %v1826_v33 = vrot.slane %v1804_v24, 7  ;;  %v1803_v34 = vld [vmem:[%s3160_s11 + $0xe] sm:$0x1] }
  0x8d   : > { %2890 = vmatprep.subr.bf16.mxu0 %v3048_v8  ;;  %2901 = vmatpush3.bf16.msra.mxu1 %v2900_v35  ;;  %v1914_v35 = vld [vmem:[%s3160_s11 + $0x2f] sm:$0x1] }
  0x8e   : > { %2902 = vmatprep.subr.bf16.mxu1 %v3048_v8  ;;  %2683 = vmatprep.mubr.msk.f32.mxu0 %vm3049_vm0, %v3050_v9  ;;  %v1827_v45 = vsel %vm302_vm1, %v1826_v33, %v1803_v34  ;;  %v1937_v48 = vrot.slane %v1914_v35, 6 }
  0x8f   : > { %2702 = vmatprep.mubr.msk.f32.mxu1 %vm3049_vm0, %v3050_v9 }
  0x90   : > { %2892 = vmatpush3.bf16.msra.mxu0 %v2891_v41  ;;  %v2274_v41 = vld [vmem:[%s3150_s10 + $0x3b8] sm:$0xff]  ;;  %v1938_v55 = vsel %vm305_vm2, %v1937_v48, %v1936_v49 }
  0x91   : > { %2893 = vmatprep.subr.bf16.mxu0 %v3048_v8  ;;  %2904 = vmatpush3.bf16.msra.mxu1 %v2903_v44  ;;  %v1828_v44 = vrot.slane %v1805_v32, 6  ;;  %v2921_v50 = vpack.c.bf16 %v2274_v41, %v2273_v40 }
  0x92   : > { %2905 = vmatprep.subr.bf16.mxu1 %v3048_v8 }
  0x93   : > { %v1829_v52 = vsel %vm305_vm2, %v1828_v44, %v1827_v45 }
  0x94   : > { %2895 = vmatpush3.bf16.msra.mxu0 %v2894_v54  ;;  %v1939_v54 = vrot.slane %v1915_v47, 5 }
  0x95   : > { %2896 = vmatprep.subr.bf16.mxu0 %v3048_v8  ;;  %2907 = vmatpush3.bf16.msra.mxu1 %v2906_v56  ;;  %v1831_v56 = vsel %vm308_vm3, %v1830_v51, %v1829_v52 }
  0x96   : > { %2908 = vmatprep.subr.bf16.mxu1 %v3048_v8  ;;  %v1940_v57 = vsel %vm308_vm3, %v1939_v54, %v1938_v55 }
  0x98   : > { %2898 = vmatpush3.bf16.msra.mxu0 %v2897_v4 }
  0x99   : > { %2910 = vmatpush3.bf16.msra.mxu1 %v2909_v7  ;;  %2911 = vmatprep.subr.bf16.mxu0 %v3048_v8 }
  0x9a   : > { %2923 = vmatprep.subr.bf16.mxu1 %v3048_v8 }
  0x9b   : > { %2684 = vmatmul.mubr.msk.f32.vlgmr.msra.gmra.mrb[12].mxu0 %vm310_vm4, %v1613_v16 }
  0x9c   : > { %2913 = vmatpush3.bf16.msra.mxu0 %v2912_v17  ;;  %2703 = vmatmul.mubr.msk.f32.vlgmr.msra.gmra.mrb[12].mxu1 %vm310_vm4, %v1722_v18 }
  0x9d   : > { %2914 = vmatprep.subr.bf16.mxu0 %v3048_v8  ;;  %2925 = vmatpush3.bf16.msra.mxu1 %v2924_v19 }
  0x9e   : > { %2926 = vmatprep.subr.bf16.mxu1 %v3048_v8  ;;  %2721 = vmatprep.mubr.msk.f32.mxu0 %vm3049_vm0, %v3050_v9 }
  0x9f   : > { %2740 = vmatprep.mubr.msk.f32.mxu1 %vm3049_vm0, %v3050_v9  ;;  %v2283_v9 = vld [vmem:[%s3150_s10 + $0x3f0] sm:$0xff]  ;;  %s2036_s10 = sshll.u32 %s3548_s8, 4  ;;  %s3602_s10 = int_to_ptr.vmem [resolvable:$true] %s2036_s10 }
  0xa0   : > { %2916 = vmatpush3.bf16.msra.mxu0 %v2915_v25  ;;  %v2933_v53 = vpack.c.bf16 %v2284_v46, %v2283_v9  ;;  %s2984_s24 = scalar_lea.vmem %s3602_s10, 128  ;;  %p2991_p4 = scmp.lt.s32.totalorder %s3602_s10, %s2989_s25 }
  0xa1   : > { %2917 = vmatprep.subr.bf16.mxu0 %v3048_v8  ;;  %2928 = vmatpush3.bf16.msra.mxu1 %v2927_v27  ;;  %p2985_p1 = scmp.ne.s32.totalorder %s3602_s10, %s2984_s24 }
  0xa2   : > { %2929 = vmatprep.subr.bf16.mxu1 %v3048_v8 }
  0xa3   : > { %p2986_p2 = pnand %p2985_p1, %p3118_p6 }
  0xa4   : > { %2919 = vmatpush3.bf16.msra.mxu0 %v2918_v37 }
  0xa5   : > { %2920 = vmatprep.subr.bf16.mxu0 %v3048_v8  ;;  %2931 = vmatpush3.bf16.msra.mxu1 %v2930_v39  ;;  %p2987_p3 = pneg %p2986_p2 }
  0xa6   : > { %2932 = vmatprep.subr.bf16.mxu1 %v3048_v8 }
  0xa8   : > { %2922 = vmatpush3.bf16.msra.mxu0 %v2921_v50 }
  0xa9   : > { %2934 = vmatpush3.bf16.msra.mxu1 %v2933_v53 }
  0xab   : > { %2722 = vmatmul.mubr.msk.f32.vlgmr.msra.gmra.mrb[14].mxu0 %vm310_vm4, %v1831_v56 }
  0xac   : > { %2741 = vmatmul.mubr.msk.f32.vlgmr.msra.gmra.mrb[14].mxu1 %vm310_vm4, %v1940_v57 }
  0xb5   : > { %v415_v58 = vpop.permute.xlu0 %414  ;;  %v525_v2 = vpop.permute.xlu1 %524 }
  0xb9   : > { %v1288_v1 = vpop.permute.xlu0 %1287  ;;  %v1397_v33 = vpop.permute.xlu1 %1396 }
  0xbd   : > { %v635_v4 = vpop.permute.xlu0 %634 }
  0xc1   : > { %v1506_v35 = vpop.permute.xlu1 %1505 }
  0xc2   : > { %v745_v11 = vpop.permute.xlu0 %744 }
  0xc6   : > { %v855_v13 = vpop.permute.xlu0 %854 }
  0xca   : > { %v965_v19 = vpop.permute.xlu0 %964 }
  0xd1   : > { %v1075_v21 = vpop.permute.xlu0 %1074 }
 0x10e   : > { %v379_v59 = vpop.f32.mrb[0].mxu0 }
 0x10f   : > { %v380_v60 = vadd.f32 %v3319_v43, %v379_v59  ;;  %v2457_v61 = vpop.f32.mrb[1].mxu0  ;;  %v485_v8 = vpop.f32.mrb[0].mxu1 }
 0x110   : > { %v486_v63 = vadd.f32 %v485_v8, %v415_v58  ;;  %v2476_v0 = vpop.f32.mrb[1].mxu1 }
 0x111   : > { %384 = vst.msk [vmem:[%s3548_s8] sm:$0xf] %vm383_vm5, %v380_v60 }
 0x112   : > { %490 = vrot.lane.b32.xlu0 %v486_v63, %s3057_s6 }
 0x11e   : > { %v595_v3 = vpop.f32.mrb[2].mxu0 }
 0x11f   : > { %v596_v5 = vadd.f32 %v595_v3, %v525_v2  ;;  %v2495_v6 = vpop.f32.mrb[3].mxu0  ;;  %v705_v7 = vpop.f32.mrb[2].mxu1 }
 0x120   : > { %v2514_v10 = vpop.f32.mrb[3].mxu1  ;;  %v706_v43 = vadd.f32 %v705_v7, %v635_v4 }
 0x121   : > { %600 = vrot.lane.b32.xlu0 %v596_v5, %s3056_s4 }
 0x125   : > { %710 = vrot.lane.b32.xlu0 %v706_v43, %s3055_s30 }
 0x12e   : > { %v815_v12 = vpop.f32.mrb[4].mxu0 }
 0x12f   : > { %v816_v14 = vadd.f32 %v815_v12, %v745_v11  ;;  %v2533_v15 = vpop.f32.mrb[5].mxu0  ;;  %v925_v16 = vpop.f32.mrb[4].mxu1 }
 0x130   : > { %v2552_v17 = vpop.f32.mrb[5].mxu1  ;;  %v926_v18 = vadd.f32 %v925_v16, %v855_v13 }
 0x131   : > { %820 = vrot.lane.b32.xlu0 %v816_v14, %s3054_s29 }
 0x135   : > { %930 = vrot.lane.b32.xlu0 %v926_v18, %s3053_s28 }
 0x13e   : > { %v1035_v20 = vpop.f32.mrb[6].mxu0 }
 0x13f   : > { %v1036_v22 = vadd.f32 %v1035_v20, %v965_v19  ;;  %v2571_v23 = vpop.f32.mrb[7].mxu0  ;;  %v1145_v24 = vpop.f32.mrb[6].mxu1 }
 0x140   : > { %v2590_v25 = vpop.f32.mrb[7].mxu1  ;;  %v1146_v26 = vadd.f32 %v1145_v24, %v1075_v21 }
 0x141   : > { %1040 = vrot.lane.b32.xlu0 %v1036_v22, %s3052_s27 }
 0x145   : > { %1150 = vrot.lane.b32.xlu0 %v1146_v26, %s3051_s26 }
 0x14e   : > { %v1253_v27 = vpop.f32.mrb[8].mxu0 }
 0x14f   : > { %v1254_v28 = vadd.f32 %v3340_v62, %v1253_v27  ;;  %v2609_v29 = vpop.f32.mrb[9].mxu0  ;;  %v1358_v30 = vpop.f32.mrb[8].mxu1 }
 0x150   : > { %v1359_v31 = vadd.f32 %v1358_v30, %v1288_v1  ;;  %v2628_v32 = vpop.f32.mrb[9].mxu1  ;;  %v1615_v62 = vpop.permute.xlu1 %1614 }
 0x151   : > { %1257 = vst.msk [vmem:[%s3548_s8 + $0x4] sm:$0xf] %vm383_vm5, %v1254_v28 }
 0x152   : > { %1363 = vrot.lane.b32.xlu1 %v1359_v31, %s3057_s6 }
 0x154   : > { %v1724_v42 = vpop.permute.xlu1 %1723 }
 0x158   : > { %v1833_v48 = vpop.permute.xlu1 %1832 }
 0x15c   : > { %v1942_v50 = vpop.permute.xlu1 %1941 }
 0x15e   : > { %v1467_v34 = vpop.f32.mrb[10].mxu0 }
 0x15f   : > { %v1468_v36 = vadd.f32 %v1467_v34, %v1397_v33  ;;  %v2647_v37 = vpop.f32.mrb[11].mxu0  ;;  %v1576_v38 = vpop.f32.mrb[10].mxu1 }
 0x160   : > { %v2666_v39 = vpop.f32.mrb[11].mxu1  ;;  %v1577_v40 = vadd.f32 %v1576_v38, %v1506_v35 }
 0x161   : > { %1472 = vrot.lane.b32.xlu1 %v1468_v36, %s3056_s4 }
 0x165   : > { %1581 = vrot.lane.b32.xlu1 %v1577_v40, %s3055_s30 }
 0x16e   : > { %v1685_v41 = vpop.f32.mrb[12].mxu0 }
 0x16f   : > { %v1686_v44 = vadd.f32 %v1685_v41, %v1615_v62  ;;  %v2685_v45 = vpop.f32.mrb[13].mxu0  ;;  %v1794_v9 = vpop.f32.mrb[12].mxu1 }
 0x170   : > { %v2704_v46 = vpop.f32.mrb[13].mxu1  ;;  %v1795_v47 = vadd.f32 %v1794_v9, %v1724_v42 }
 0x171   : > { %1690 = vrot.lane.b32.xlu1 %v1686_v44, %s3054_s29 }
 0x175   : > { %1799 = vrot.lane.b32.xlu1 %v1795_v47, %s3053_s28 }
 0x17e   : > { %v1903_v49 = vpop.f32.mrb[14].mxu0 }
 0x17f   : > { %v1904_v51 = vadd.f32 %v1903_v49, %v1833_v48  ;;  %v2723_v52 = vpop.f32.mrb[15].mxu0  ;;  %v2012_v53 = vpop.f32.mrb[14].mxu1 }
 0x180   : > { %v2742_v54 = vpop.f32.mrb[15].mxu1  ;;  %v2013_v55 = vadd.f32 %v2012_v53, %v1942_v50 }
 0x181   : > { %1908 = vrot.lane.b32.xlu1 %v1904_v51, %s3052_s27 }
 0x184   : > { %v491_v56 = vpop.permute.xlu0 %490 }
 0x185   : > { %2017 = vrot.lane.b32.xlu1 %v2013_v55, %s3051_s26  ;;  %494 = vst.msk [vmem:[%s3548_s8] sm:$0xf] %vm493_vm6, %v491_v56  ;;  %s2990_s26 = scalar_lea.vmem %s2989_s25, 256 }
 0x186   : > { %p2992_p5 = scmp.lt.s32.totalorder %s2990_s26, %s2984_s24 }
 0x188   : > { %p2993_p7 = por %p2992_p5, %p2991_p4 }
 0x18a   : > { %p2994_p10 = pnand %p2993_p7, %p2987_p3 }
 0x193   : > { %v601_v57 = vpop.permute.xlu0 %600 }
 0x194   : > { %604 = vst.msk [vmem:[%s3548_s8] sm:$0xf] %vm603_vm7, %v601_v57 }
 0x197   : > { %v711_v58 = vpop.permute.xlu0 %710 }
 0x198   : > { %714 = vst.msk [vmem:[%s3548_s8] sm:$0xf] %vm713_vm8, %v711_v58 }
 0x1a3   : > { %v821_v59 = vpop.permute.xlu0 %820 }
 0x1a4   : > { %824 = vst.msk [vmem:[%s3548_s8] sm:$0xf] %vm823_vm9, %v821_v59 }
 0x1a7   : > { %v931_v60 = vpop.permute.xlu0 %930 }
 0x1a8   : > { %934 = vst.msk [vmem:[%s3548_s8] sm:$0xf] %vm933_vm10, %v931_v60 }
 0x1b3   : > { %v1041_v61 = vpop.permute.xlu0 %1040 }
 0x1b4   : > { %1044 = vst.msk [vmem:[%s3548_s8] sm:$0xf] %vm1043_vm11, %v1041_v61 }
 0x1b7   : > { %v1151_v8 = vpop.permute.xlu0 %1150 }
 0x1b8   : > { %1154 = vst.msk [vmem:[%s3548_s8] sm:$0xf] %vm1153_vm12, %v1151_v8 }
 0x1c4   : > { %v1364_v63 = vpop.permute.xlu1 %1363 }
 0x1c5   : > { %1366 = vst.msk [vmem:[%s3548_s8 + $0x4] sm:$0xf] %vm493_vm6, %v1364_v63 }
 0x1d3   : > { %v1473_v0 = vpop.permute.xlu1 %1472 }
 0x1d4   : > { %1475 = vst.msk [vmem:[%s3548_s8 + $0x4] sm:$0xf] %vm603_vm7, %v1473_v0 }
 0x1d7   : > { %v1582_v1 = vpop.permute.xlu1 %1581 }
 0x1d8   : > { %1584 = vst.msk [vmem:[%s3548_s8 + $0x4] sm:$0xf] %vm713_vm8, %v1582_v1 }
 0x1e3   : > { %v1691_v2 = vpop.permute.xlu1 %1690 }
 0x1e4   : > { %1693 = vst.msk [vmem:[%s3548_s8 + $0x4] sm:$0xf] %vm823_vm9, %v1691_v2 }
 0x1e7   : > { %v1800_v3 = vpop.permute.xlu1 %1799 }
 0x1e8   : > { %1802 = vst.msk [vmem:[%s3548_s8 + $0x4] sm:$0xf] %vm933_vm10, %v1800_v3 }
 0x1f3   : > { %v1909_v4 = vpop.permute.xlu1 %1908 }
 0x1f4   : > { %1911 = vst.msk [vmem:[%s3548_s8 + $0x4] sm:$0xf] %vm1043_vm11, %v1909_v4 }
 0x1f7   : > { %v2018_v5 = vpop.permute.xlu1 %2017 }
 0x1f8   : > { %2020 = vst.msk [vmem:[%s3548_s8 + $0x4] sm:$0xf] %vm1153_vm12, %v2018_v5 }
 0x1f9   : > { %2997 = shalt.err (!%p2994_p10)
}
 0x1fa   : > { %s2998_s5 = scalar_lea.hbm %s3600_s19, 128  ;;  %s3002_s29 = scalar_lea.hbm %s3649_s3, 256 }
 0x1fb   : > { %p2999_p11 = scmp.ne.s32.totalorder %s3600_s19, %s2998_s5  ;;  %p3003_p0 = scmp.lt.u32.totalorder %s3600_s19, %s3649_s3 }
 0x1fc   : > { %p3004_p1 = scmp.lt.u32.totalorder %s3002_s29, %s2998_s5  ;;  %p3006_p3 = scmp.lt.u32.totalorder %s2998_s5, %s3600_s19 }
 0x1fd   : > { %p3000_p12 = pnand %p2999_p11, %p3118_p6 }
 0x1fe   : > { %p3005_p2 = por %p3004_p1, %p3003_p0 }
 0x1ff   : > { %p3001_p13 = pneg %p3000_p12 }
 0x200   : > { %p3007_p4 = por %p3006_p3, %p3005_p2 }
 0x202   : > { %p3008_p5 = pnand %p3007_p4, %p3001_p13 }
 0x204   : > { %3011 = shalt.err (!%p3008_p5)
}
 0x205   : > { %2935 = dma.vmem_to_hbm [thread:$0]  (%p3118_p6), %s3602_s10, 128, %s3600_s19, %s2022_s20  }
 0x206 PF: > { %s2048_s6 = sand.u32 1, %s3034_s12   ;;  %p2938_p7 = pnand %p2124_p9, %p3122_p8 }
 0x207   : > { %s2049_s7 = scalar_lea.sflag [#allocation4], %s2048_s6 }
 0x208   : > { %3029 = dma.done.wait (!%p2938_p7), %s2049_s7, 128  }
 0x209   : > { %3031 = vsyncadd (!%p2938_p7), %s2049_s7, 4294967168  ;;  %p13_p10 = scmp.ge.s32.totalorder %s3104_s18, 4   ;;  %s3653_s12 = smov %s3038_s13 }
 0x20a   : > { %s3654_s13 = smov %s3042_s14  ;;  %s3655_s14 = smov %s3116_s21 }
 0x20b   : > { %s3656_s15 = smov %s3104_s18  ;;  %15 = sbr.rel (!%p13_p10) target bundleno = 3 (0x3), region = 131 }
 0x212   :  { %2054 = vsyncpa [#allocation4], 1 }
 0x213   :  { %2056 = vsyncpa [#allocation4 + $0x1], 1 }

</bundles_post_ra>
